<compile_context>
chip_gen: v6e
topology: v6e:2x2x1
jax: 0.10.0
libtpu: 0.0.40
codegen_flags: <defaults>
</compile_context>

<pallas_src>
import functools
import math

import jax
import jax.numpy as jnp
from jax.experimental import pallas as pl
from jax.experimental.pallas import tpu as pltpu


# ---------------------------------------------------------------------------
# Pre-pass kernel: sr-conv + LayerNorm + K/V projections, per image.
# Writes head-major K^T (nh, d, Nr) and V (nh, Nr, d) in bf16.
# ---------------------------------------------------------------------------
def _kv_kernel(xv_ref, wsr_ref, bsr_ref, wk_ref, wv_ref, bk_ref, bv_ref,
               kT_ref, v3_ref, *, num_heads, eps):
    Hr, sr, Wr = xv_ref.shape[1], xv_ref.shape[2], xv_ref.shape[3]
    Nr = Hr * Wr
    C = wk_ref.shape[0]
    d = C // num_heads

    xv = xv_ref[0]                                        # (Hr, sr, Wr, sr*C) bf16
    # sr-conv (kernel=stride=sr) as `sr` MXU matmuls with contraction sr*C;
    # accumulator seeded with the i=0 matmul, bias added once at the end.
    xr = jnp.dot(xv[:, 0].reshape(Nr, sr * C), wsr_ref[0],
                 preferred_element_type=jnp.float32)
    for i in range(1, sr):
        xr = xr + jnp.dot(xv[:, i].reshape(Nr, sr * C), wsr_ref[i],
                          preferred_element_type=jnp.float32)
    xr = xr + bsr_ref[...]

    # LayerNorm (eps, biased variance); affine folded into Wk/Wv/bk/bv on host.
    mean = jnp.mean(xr, axis=-1, keepdims=True)
    var = jnp.mean(jnp.square(xr - mean), axis=-1, keepdims=True)
    xn = ((xr - mean) * jax.lax.rsqrt(var + eps)).astype(jnp.bfloat16)

    k = jnp.dot(xn, wk_ref[...], preferred_element_type=jnp.float32) + bk_ref[...]
    v = jnp.dot(xn, wv_ref[...], preferred_element_type=jnp.float32) + bv_ref[...]

    # Head-major layouts for the attention kernel:
    #   K^T per head: (Nr, C) -> (C, Nr) -> (nh, d, Nr)  (leading-dim split is free)
    kT_ref[0] = k.astype(jnp.bfloat16).T.reshape(num_heads, d, Nr)
    v3_ref[0] = jnp.transpose(v.astype(jnp.bfloat16).reshape(Nr, num_heads, d),
                              (1, 0, 2))


# ---------------------------------------------------------------------------
# Attention kernel: one (batch, query-tile) step; no in-kernel relayouts.
# ---------------------------------------------------------------------------
def _attn_kernel(x_ref, wq3_ref, kT_ref, v3_ref, wproj3_ref, bproj_ref, o_ref,
                 *, num_heads):
    x = x_ref[0]                                          # (tq, C) bf16
    y = None
    for h in range(num_heads):
        # Q projection for head h (attention scale pre-folded into wq3).
        q_h = jnp.dot(x, wq3_ref[h], preferred_element_type=jnp.float32)      # (tq, d)
        # Scores against pre-transposed K^T (d, Nr).
        s = jnp.dot(q_h.astype(jnp.bfloat16), kT_ref[0, h],
                    preferred_element_type=jnp.float32)                        # (tq, Nr)
        s = s - jnp.max(s, axis=-1, keepdims=True)
        p = jnp.exp(s)
        p = p * pl.reciprocal(jnp.sum(p, axis=-1, keepdims=True), approx=True)
        # Weighted values, then output projection folded per head (accumulate).
        o_h = jnp.dot(p.astype(jnp.bfloat16), v3_ref[0, h],
                      preferred_element_type=jnp.float32)                      # (tq, d)
        y_h = jnp.dot(o_h.astype(jnp.bfloat16), wproj3_ref[h],
                      preferred_element_type=jnp.float32)                      # (tq, C)
        y = y_h if y is None else y + y_h
    y = y + bproj_ref[...]
    # TODO(synk): if profiling shows the store slot bound on v5e, present a
    # lane-dense (>=128-wide) output slab instead of the (tq, C=64) tile.
    o_ref[0] = y.astype(o_ref.dtype)


def _const_spec(shape, single_buffer):
    """BlockSpec for a grid-invariant block (optionally single-buffered)."""
    rank = len(shape)

    def index_map(*_):
        return (0,) * rank

    if single_buffer:
        return pl.BlockSpec(shape, index_map, pipeline_mode=pl.Buffered(1))
    return pl.BlockSpec(shape, index_map)


def pvt_attention(x, H, W, params, *, num_heads, sr_ratio, tq=256):
    """Pallas implementation of PVTv2 Attention.forward (linear=False, sr_ratio>1)."""
    # TODO(synk): sr_ratio==1 and linear=True branches are not implemented here.
    assert sr_ratio > 1
    wq, wkv, wsr, bsr, lnw, lnb, wproj, bproj = params
    B, N, C = x.shape
    nh = num_heads
    d = C // nh
    scale = d ** -0.5
    assert H % sr_ratio == 0 and W % sr_ratio == 0 and N == H * W
    Hr, Wr = H // sr_ratio, W // sr_ratio
    Nr = Hr * Wr
    sr = sr_ratio

    tq = int(min(tq, N))
    NQ = pl.cdiv(N, tq)           # masked tail handled by Pallas if N % tq != 0

    out_dtype = x.dtype
    cdt = jnp.bfloat16            # MXU operand dtype (f32 accumulation in-kernel)

    # ---- host-side prep ----------------------------------------------------
    # Activations in bf16; xv is a free reshape view of x for the sr-conv:
    # (B, H, W, C) -> (B, Hr, sr, Wr, sr*C), no transpose, no extra HBM tensor.
    x_c = x.astype(cdt)
    xv = x_c.reshape(B, Hr, sr, Wr, sr * C)

    # Wq pre-split per head, scale folded:  (nh, C, d)
    wq3 = (wq.T * scale).reshape(C, nh, d).transpose(1, 0, 2).astype(cdt)
    # sr-conv weight: per kernel-row i, an (sr*C, C) slab with index (j*C + c_in, o).
    wsr_stack = jnp.stack(
        [wsr[:, :, i, :].transpose(2, 1, 0).reshape(sr * C, C) for i in range(sr)],
        axis=0).astype(cdt)                                                  # (sr, sr*C, C)
    bsr2 = bsr.reshape(1, C).astype(jnp.float32)
    # LayerNorm affine folded into the K/V projections (qkv_bias=False).
    wk, wv = wkv[:C, :], wkv[C:, :]
    wk_t = (lnw[:, None] * wk.T).astype(cdt)                                 # (C, C)
    wv_t = (lnw[:, None] * wv.T).astype(cdt)                                 # (C, C)
    bk = (lnb @ wk.T).reshape(1, C).astype(jnp.float32)
    bv = (lnb @ wv.T).reshape(1, C).astype(jnp.float32)
    # Wproj pre-split per head (fold the head-merge transpose into the proj): (nh, d, C)
    wproj3 = wproj.T.reshape(nh, d, C).astype(cdt)
    bproj2 = bproj.reshape(1, C).astype(jnp.float32)
    # TODO(synk): attn_drop/proj_drop are identity at rate 0.0 and are omitted.
    # TODO(synk): int8 (v5e/v6e) / fp8 (v7x) projection weights not applied (accuracy-dependent).

    kv_kernel = functools.partial(_kv_kernel, num_heads=nh, eps=1e-5)
    attn_kernel = functools.partial(_attn_kernel, num_heads=nh)

    vmem_limit = 64 * 1024 * 1024
    itemsize_out = jnp.dtype(out_dtype).itemsize

    kv_cost = pl.CostEstimate(
        flops=B * (2 * Nr * (sr * sr * C) * C + 4 * Nr * C * C),
        transcendentals=B * Nr,
        bytes_accessed=(B * N * C * 2 + sr * sr * C * C * 2 + 2 * C * C * 2
                        + 3 * C * 4 + 2 * B * C * Nr * 2))
    attn_cost = pl.CostEstimate(
        flops=B * (4 * N * C * C + 4 * N * Nr * C),
        transcendentals=B * nh * N * Nr,
        bytes_accessed=(B * N * C * 2 + 2 * B * C * Nr * 2 + 2 * C * C * 2
                        + C * 4 + B * N * C * itemsize_out))

    def run(single_buffer):
        inv = lambda shape: _const_spec(shape, single_buffer)

        # ---- pre-pass: per-image K^T / V (head-major, bf16) ----------------
        kT3, v3 = pl.pallas_call(
            kv_kernel,
            out_shape=(jax.ShapeDtypeStruct((B, nh, d, Nr), cdt),
                       jax.ShapeDtypeStruct((B, nh, Nr, d), cdt)),
            grid_spec=pltpu.PrefetchScalarGridSpec(
                num_scalar_prefetch=0,
                grid=(B,),
                in_specs=[
                    pl.BlockSpec((1, Hr, sr, Wr, sr * C),
                                 lambda b: (b, 0, 0, 0, 0)),                  # x view (kv path)
                    inv((sr, sr * C, C)),                                     # Wsr stack
                    inv((1, C)),                                              # b_sr
                    inv((C, C)),                                              # Wk (LN-folded)
                    inv((C, C)),                                              # Wv (LN-folded)
                    inv((1, C)),                                              # bk
                    inv((1, C)),                                              # bv
                ],
                out_specs=(pl.BlockSpec((1, nh, d, Nr), lambda b: (b, 0, 0, 0)),
                           pl.BlockSpec((1, nh, Nr, d), lambda b: (b, 0, 0, 0))),
            ),
            compiler_params=pltpu.CompilerParams(
                dimension_semantics=("parallel",),
                vmem_limit_bytes=vmem_limit),
            cost_estimate=kv_cost,
        )(xv, wsr_stack, bsr2, wk_t, wv_t, bk, bv)

        # ---- attention: fully parallel (batch x query-tile) grid ----------
        return pl.pallas_call(
            attn_kernel,
            out_shape=jax.ShapeDtypeStruct((B, N, C), out_dtype),
            grid_spec=pltpu.PrefetchScalarGridSpec(
                num_scalar_prefetch=0,
                grid=(B, NQ),
                in_specs=[
                    pl.BlockSpec((1, tq, C), lambda b, qt: (b, qt, 0)),       # x (q path)
                    inv((nh, C, d)),                                          # Wq (scaled, per-head)
                    pl.BlockSpec((1, nh, d, Nr), lambda b, qt: (b, 0, 0, 0)), # K^T
                    pl.BlockSpec((1, nh, Nr, d), lambda b, qt: (b, 0, 0, 0)), # V
                    inv((nh, d, C)),                                          # Wproj (per-head)
                    inv((1, C)),                                              # b_proj
                ],
                out_specs=pl.BlockSpec((1, tq, C), lambda b, qt: (b, qt, 0)),
            ),
            compiler_params=pltpu.CompilerParams(
                dimension_semantics=("parallel", "parallel"),
                vmem_limit_bytes=vmem_limit),
            cost_estimate=attn_cost,
        )(x_c, wq3, kT3, v3, wproj3, bproj2)

    try:
        return run(True)
    except Exception:
        # Fallback: some Pallas builds reject single-buffered (Buffered(1)) specs;
        # retry with the default double buffering (identical semantics).
        return run(False)


def ref_attention(x, H, W, params, *, num_heads, sr_ratio):
    """Pure-JAX f32 reference mirroring the PyTorch forward (for verification)."""
    wq, wkv, wsr, bsr, lnw, lnb, wproj, bproj = params
    B, N, C = x.shape
    d = C // num_heads
    scale = d ** -0.5

    q = x @ wq.T
    q = q.reshape(B, N, num_heads, d).transpose(0, 2, 1, 3)

    x_ = x.transpose(0, 2, 1).reshape(B, C, H, W)
    x_ = jax.lax.conv_general_dilated(
        x_, wsr, window_strides=(sr_ratio, sr_ratio), padding='VALID',
        dimension_numbers=('NCHW', 'OIHW', 'NCHW'))
    x_ = x_ + bsr.reshape(1, C, 1, 1)
    x_ = x_.reshape(B, C, -1).transpose(0, 2, 1)

    mean = x_.mean(-1, keepdims=True)
    var = ((x_ - mean) ** 2).mean(-1, keepdims=True)
    x_ = (x_ - mean) / jnp.sqrt(var + 1e-5) * lnw + lnb

    kv = x_ @ wkv.T
    Nr = x_.shape[1]
    kv = kv.reshape(B, Nr, 2, num_heads, d).transpose(2, 0, 3, 1, 4)
    k, v = kv[0], kv[1]

    attn = (q @ k.transpose(0, 1, 3, 2)) * scale
    attn = jax.nn.softmax(attn, axis=-1)
    out = (attn @ v).transpose(0, 2, 1, 3).reshape(B, N, C)
    return out @ wproj.T + bproj


if __name__ == "__main__":
    # Small shapes consistent with the module (PVT-style head_dim, sr-conv active).
    B, H, W = 2, 16, 16
    C = 64
    num_heads = 2
    sr_ratio = 2
    N = H * W

    key = jax.random.PRNGKey(0)
    kx, kq, kkv, ksr, kproj, kb1, kb2, kln1, kln2 = jax.random.split(key, 9)

    x = jax.random.normal(kx, (B, N, C), dtype=jnp.float32)

    wq = 0.02 * jax.random.normal(kq, (C, C), dtype=jnp.float32)
    wkv = 0.02 * jax.random.normal(kkv, (2 * C, C), dtype=jnp.float32)
    fan_out = sr_ratio * sr_ratio * C
    wsr = math.sqrt(2.0 / fan_out) * jax.random.normal(
        ksr, (C, C, sr_ratio, sr_ratio), dtype=jnp.float32)      # conv weight (O, I, kh, kw)
    bsr = 0.02 * jax.random.normal(kb1, (C,), dtype=jnp.float32)
    lnw = 1.0 + 0.1 * jax.random.normal(kln1, (C,), dtype=jnp.float32)
    lnb = 0.1 * jax.random.normal(kln2, (C,), dtype=jnp.float32)
    wproj = 0.02 * jax.random.normal(kproj, (C, C), dtype=jnp.float32)
    bproj = 0.02 * jax.random.normal(kb2, (C,), dtype=jnp.float32)

    params = (wq, wkv, wsr, bsr, lnw, lnb, wproj, bproj)

    out = pvt_attention(x, H, W, params, num_heads=num_heads, sr_ratio=sr_ratio)
    out = jax.block_until_ready(out)

    ref = ref_attention(x, H, W, params, num_heads=num_heads, sr_ratio=sr_ratio)
    assert out.shape == (B, N, C)
    max_err = float(jnp.max(jnp.abs(out - ref)))
    assert jnp.allclose(out, ref, atol=2e-2, rtol=2e-2), max_err

    print("KERNEL_OK")
</pallas_src>

<mosaic_0001>
module attributes {stable_mosaic.version = 11 : i64} {
  func.func @_kv_kernel(%arg0: i32, %arg1: memref<1x8x2x8x128xbf16, #tpu.memory_space<vmem>>, %arg2: memref<2x128x64xbf16, #tpu.memory_space<vmem>>, %arg3: memref<1x64xf32, #tpu.memory_space<vmem>>, %arg4: memref<64x64xbf16, #tpu.memory_space<vmem>>, %arg5: memref<64x64xbf16, #tpu.memory_space<vmem>>, %arg6: memref<1x64xf32, #tpu.memory_space<vmem>>, %arg7: memref<1x64xf32, #tpu.memory_space<vmem>>, %arg8: memref<1x2x32x64xbf16, #tpu.memory_space<vmem>>, %arg9: memref<1x2x64x32xbf16, #tpu.memory_space<vmem>>) attributes {dimension_semantics = [#tpu.dimension_semantics<parallel>], iteration_bounds = array<i64: 2>, scalar_prefetch = 0 : i64, scratch_operands = 0 : i64, tpu.core_type = #tpu.core_type<tc>, window_params = [{transform_indices = @transform_0, window_bounds = array<i64: 1, 8, 2, 8, 128>}, {pipeline_mode = #tpu.pipeline_mode<synchronous>, transform_indices = @transform_1, window_bounds = array<i64: 2, 128, 64>}, {pipeline_mode = #tpu.pipeline_mode<synchronous>, transform_indices = @transform_2, window_bounds = array<i64: 1, 64>}, {pipeline_mode = #tpu.pipeline_mode<synchronous>, transform_indices = @transform_3, window_bounds = array<i64: 64, 64>}, {pipeline_mode = #tpu.pipeline_mode<synchronous>, transform_indices = @transform_4, window_bounds = array<i64: 64, 64>}, {pipeline_mode = #tpu.pipeline_mode<synchronous>, transform_indices = @transform_5, window_bounds = array<i64: 1, 64>}, {pipeline_mode = #tpu.pipeline_mode<synchronous>, transform_indices = @transform_6, window_bounds = array<i64: 1, 64>}, {transform_indices = @transform_7, window_bounds = array<i64: 1, 2, 32, 64>}, {transform_indices = @transform_8, window_bounds = array<i64: 1, 2, 64, 32>}]} {
    %c0 = arith.constant 0 : index
    %c0_0 = arith.constant 0 : index
    %c0_1 = arith.constant 0 : index
    %c0_2 = arith.constant 0 : index
    %c0_3 = arith.constant 0 : index
    %0 = vector.load %arg1[%c0, %c0_0, %c0_1, %c0_2, %c0_3] : memref<1x8x2x8x128xbf16, #tpu.memory_space<vmem>>, vector<1x8x2x8x128xbf16>
    %1 = vector.shape_cast %0 : vector<1x8x2x8x128xbf16> to vector<8x2x8x128xbf16>
    %2 = vector.extract_strided_slice %1 {offsets = [0, 0, 0, 0], sizes = [8, 1, 8, 128], strides = [1, 1, 1, 1]} : vector<8x2x8x128xbf16> to vector<8x1x8x128xbf16>
    %3 = vector.shape_cast %2 : vector<8x1x8x128xbf16> to vector<8x8x128xbf16>
    %4 = vector.shape_cast %3 : vector<8x8x128xbf16> to vector<64x128xbf16>
    %c0_4 = arith.constant 0 : index
    %c0_5 = arith.constant 0 : index
    %c0_6 = arith.constant 0 : index
    %5 = vector.load %arg2[%c0_4, %c0_5, %c0_6] : memref<2x128x64xbf16, #tpu.memory_space<vmem>>, vector<1x128x64xbf16>
    %6 = vector.shape_cast %5 : vector<1x128x64xbf16> to vector<128x64xbf16>
    %cst = arith.constant dense<0.000000e+00> : vector<64x64xf32>
    %7 = tpu.matmul %4, %6, %cst {dimension_numbers = #tpu.dot_dimension_numbers<[1], [0], [0], [1], [0, 0, 1, 1], [], []>} : vector<64x128xbf16>, vector<128x64xbf16>, vector<64x64xf32> -> vector<64x64xf32>
    %8 = vector.extract_strided_slice %1 {offsets = [0, 1, 0, 0], sizes = [8, 1, 8, 128], strides = [1, 1, 1, 1]} : vector<8x2x8x128xbf16> to vector<8x1x8x128xbf16>
    %9 = vector.shape_cast %8 : vector<8x1x8x128xbf16> to vector<8x8x128xbf16>
    %10 = vector.shape_cast %9 : vector<8x8x128xbf16> to vector<64x128xbf16>
    %c1 = arith.constant 1 : index
    %c0_7 = arith.constant 0 : index
    %c0_8 = arith.constant 0 : index
    %11 = vector.load %arg2[%c1, %c0_7, %c0_8] : memref<2x128x64xbf16, #tpu.memory_space<vmem>>, vector<1x128x64xbf16>
    %12 = vector.shape_cast %11 : vector<1x128x64xbf16> to vector<128x64xbf16>
    %cst_9 = arith.constant dense<0.000000e+00> : vector<64x64xf32>
    %13 = tpu.matmul %10, %12, %cst_9 {dimension_numbers = #tpu.dot_dimension_numbers<[1], [0], [0], [1], [0, 0, 1, 1], [], []>} : vector<64x128xbf16>, vector<128x64xbf16>, vector<64x64xf32> -> vector<64x64xf32>
    %14 = arith.addf %7, %13 : vector<64x64xf32>
    %c0_10 = arith.constant 0 : index
    %c0_11 = arith.constant 0 : index
    %15 = vector.load %arg3[%c0_10, %c0_11] : memref<1x64xf32, #tpu.memory_space<vmem>>, vector<1x64xf32>
    %16 = vector.broadcast %15 : vector<1x64xf32> to vector<64x64xf32>
    %17 = arith.addf %14, %16 : vector<64x64xf32>
    %cst_12 = arith.constant dense<0.000000e+00> : vector<64xf32>
    %18 = vector.multi_reduction <add>, %17, %cst_12 [1] : vector<64x64xf32> to vector<64xf32>
    %19 = vector.shape_cast %18 : vector<64xf32> to vector<64x1xf32>
    %cst_13 = arith.constant 6.400000e+01 : f32
    %20 = vector.broadcast %cst_13 : f32 to vector<64x1xf32>
    %21 = arith.divf %19, %20 : vector<64x1xf32>
    %22 = vector.broadcast %21 : vector<64x1xf32> to vector<64x64xf32>
    %23 = arith.subf %17, %22 : vector<64x64xf32>
    %24 = arith.mulf %23, %23 : vector<64x64xf32>
    %cst_14 = arith.constant dense<0.000000e+00> : vector<64xf32>
    %25 = vector.multi_reduction <add>, %24, %cst_14 [1] : vector<64x64xf32> to vector<64xf32>
    %26 = vector.shape_cast %25 : vector<64xf32> to vector<64x1xf32>
    %cst_15 = arith.constant 6.400000e+01 : f32
    %27 = vector.broadcast %cst_15 : f32 to vector<64x1xf32>
    %28 = arith.divf %26, %27 : vector<64x1xf32>
    %29 = vector.broadcast %21 : vector<64x1xf32> to vector<64x64xf32>
    %30 = arith.subf %17, %29 : vector<64x64xf32>
    %cst_16 = arith.constant 9.99999974E-6 : f32
    %31 = vector.broadcast %cst_16 : f32 to vector<64x1xf32>
    %32 = arith.addf %28, %31 : vector<64x1xf32>
    %33 = math.rsqrt %32 : vector<64x1xf32>
    %34 = vector.broadcast %33 : vector<64x1xf32> to vector<64x64xf32>
    %35 = arith.mulf %30, %34 : vector<64x64xf32>
    %36 = arith.truncf %35 : vector<64x64xf32> to vector<64x64xbf16>
    %c0_17 = arith.constant 0 : index
    %c0_18 = arith.constant 0 : index
    %37 = vector.load %arg4[%c0_17, %c0_18] : memref<64x64xbf16, #tpu.memory_space<vmem>>, vector<64x64xbf16>
    %cst_19 = arith.constant dense<0.000000e+00> : vector<64x64xf32>
    %38 = tpu.matmul %36, %37, %cst_19 {dimension_numbers = #tpu.dot_dimension_numbers<[1], [0], [0], [1], [0, 0, 1, 1], [], []>} : vector<64x64xbf16>, vector<64x64xbf16>, vector<64x64xf32> -> vector<64x64xf32>
    %c0_20 = arith.constant 0 : index
    %c0_21 = arith.constant 0 : index
    %39 = vector.load %arg6[%c0_20, %c0_21] : memref<1x64xf32, #tpu.memory_space<vmem>>, vector<1x64xf32>
    %40 = vector.broadcast %39 : vector<1x64xf32> to vector<64x64xf32>
    %41 = arith.addf %38, %40 : vector<64x64xf32>
    %c0_22 = arith.constant 0 : index
    %c0_23 = arith.constant 0 : index
    %42 = vector.load %arg5[%c0_22, %c0_23] : memref<64x64xbf16, #tpu.memory_space<vmem>>, vector<64x64xbf16>
    %cst_24 = arith.constant dense<0.000000e+00> : vector<64x64xf32>
    %43 = tpu.matmul %36, %42, %cst_24 {dimension_numbers = #tpu.dot_dimension_numbers<[1], [0], [0], [1], [0, 0, 1, 1], [], []>} : vector<64x64xbf16>, vector<64x64xbf16>, vector<64x64xf32> -> vector<64x64xf32>
    %c0_25 = arith.constant 0 : index
    %c0_26 = arith.constant 0 : index
    %44 = vector.load %arg7[%c0_25, %c0_26] : memref<1x64xf32, #tpu.memory_space<vmem>>, vector<1x64xf32>
    %45 = vector.broadcast %44 : vector<1x64xf32> to vector<64x64xf32>
    %46 = arith.addf %43, %45 : vector<64x64xf32>
    %47 = arith.truncf %41 : vector<64x64xf32> to vector<64x64xbf16>
    %48 = tpu.transpose %47, [1, 0] : vector<64x64xbf16> -> vector<64x64xbf16>
    %49 = vector.shape_cast %48 : vector<64x64xbf16> to vector<2x32x64xbf16>
    %c0_27 = arith.constant 0 : index
    %c0_28 = arith.constant 0 : index
    %c0_29 = arith.constant 0 : index
    %c0_30 = arith.constant 0 : index
    %50 = vector.load %arg8[%c0_27, %c0_28, %c0_29, %c0_30] : memref<1x2x32x64xbf16, #tpu.memory_space<vmem>>, vector<1x2x32x64xbf16>
    %51 = vector.shape_cast %50 : vector<1x2x32x64xbf16> to vector<2x32x64xbf16>
    %52 = vector.shape_cast %49 : vector<2x32x64xbf16> to vector<1x2x32x64xbf16>
    tpu.vector_store %arg8[%c0_27, %c0_28, %c0_29, %c0_30], %52 {strides = array<i32>} : memref<1x2x32x64xbf16, #tpu.memory_space<vmem>>, vector<1x2x32x64xbf16>,
    %53 = arith.truncf %46 : vector<64x64xf32> to vector<64x64xbf16>
    %54 = vector.shape_cast %53 : vector<64x64xbf16> to vector<64x2x32xbf16>
    %55 = tpu.transpose %54, [1, 0, 2] : vector<64x2x32xbf16> -> vector<2x64x32xbf16>
    %c0_31 = arith.constant 0 : index
    %c0_32 = arith.constant 0 : index
    %c0_33 = arith.constant 0 : index
    %c0_34 = arith.constant 0 : index
    %56 = vector.load %arg9[%c0_31, %c0_32, %c0_33, %c0_34] : memref<1x2x64x32xbf16, #tpu.memory_space<vmem>>, vector<1x2x64x32xbf16>
    %57 = vector.shape_cast %56 : vector<1x2x64x32xbf16> to vector<2x64x32xbf16>
    %58 = vector.shape_cast %55 : vector<2x64x32xbf16> to vector<1x2x64x32xbf16>
    tpu.vector_store %arg9[%c0_31, %c0_32, %c0_33, %c0_34], %58 {strides = array<i32>} : memref<1x2x64x32xbf16, #tpu.memory_space<vmem>>, vector<1x2x64x32xbf16>,
    return
  }
  func.func @transform_0(%arg0: i32) -> (i32, i32, i32, i32, i32) {
    %c0_i32 = arith.constant 0 : i32
    %c0_i32_0 = arith.constant 0 : i32
    %c0_i32_1 = arith.constant 0 : i32
    %c0_i32_2 = arith.constant 0 : i32
    %c0_i32_3 = arith.constant 0 : i32
    return %arg0, %c0_i32, %c0_i32_0, %c0_i32_1, %c0_i32_2 : i32, i32, i32, i32, i32
  }
  func.func @transform_1(%arg0: i32) -> (i32, i32, i32) {
    %c0_i32 = arith.constant 0 : i32
    %c0_i32_0 = arith.constant 0 : i32
    %c0_i32_1 = arith.constant 0 : i32
    %c0_i32_2 = arith.constant 0 : i32
    return %c0_i32, %c0_i32_0, %c0_i32_1 : i32, i32, i32
  }
  func.func @transform_2(%arg0: i32) -> (i32, i32) {
    %c0_i32 = arith.constant 0 : i32
    %c0_i32_0 = arith.constant 0 : i32
    %c0_i32_1 = arith.constant 0 : i32
    return %c0_i32, %c0_i32_0 : i32, i32
  }
  func.func @transform_3(%arg0: i32) -> (i32, i32) {
    %c0_i32 = arith.constant 0 : i32
    %c0_i32_0 = arith.constant 0 : i32
    %c0_i32_1 = arith.constant 0 : i32
    return %c0_i32, %c0_i32_0 : i32, i32
  }
  func.func @transform_4(%arg0: i32) -> (i32, i32) {
    %c0_i32 = arith.constant 0 : i32
    %c0_i32_0 = arith.constant 0 : i32
    %c0_i32_1 = arith.constant 0 : i32
    return %c0_i32, %c0_i32_0 : i32, i32
  }
  func.func @transform_5(%arg0: i32) -> (i32, i32) {
    %c0_i32 = arith.constant 0 : i32
    %c0_i32_0 = arith.constant 0 : i32
    %c0_i32_1 = arith.constant 0 : i32
    return %c0_i32, %c0_i32_0 : i32, i32
  }
  func.func @transform_6(%arg0: i32) -> (i32, i32) {
    %c0_i32 = arith.constant 0 : i32
    %c0_i32_0 = arith.constant 0 : i32
    %c0_i32_1 = arith.constant 0 : i32
    return %c0_i32, %c0_i32_0 : i32, i32
  }
  func.func @transform_7(%arg0: i32) -> (i32, i32, i32, i32) {
    %c0_i32 = arith.constant 0 : i32
    %c0_i32_0 = arith.constant 0 : i32
    %c0_i32_1 = arith.constant 0 : i32
    %c0_i32_2 = arith.constant 0 : i32
    return %arg0, %c0_i32, %c0_i32_0, %c0_i32_1 : i32, i32, i32, i32
  }
  func.func @transform_8(%arg0: i32) -> (i32, i32, i32, i32) {
    %c0_i32 = arith.constant 0 : i32
    %c0_i32_0 = arith.constant 0 : i32
    %c0_i32_1 = arith.constant 0 : i32
    %c0_i32_2 = arith.constant 0 : i32
    return %arg0, %c0_i32, %c0_i32_0, %c0_i32_1 : i32, i32, i32, i32
  }
}

module attributes {stable_mosaic.version = 11 : i64} {
  func.func @_kv_kernel(%arg0: i32, %arg1: memref<1x8x2x8x128xbf16, #tpu.memory_space<vmem>>, %arg2: memref<2x128x64xbf16, #tpu.memory_space<vmem>>, %arg3: memref<1x64xf32, #tpu.memory_space<vmem>>, %arg4: memref<64x64xbf16, #tpu.memory_space<vmem>>, %arg5: memref<64x64xbf16, #tpu.memory_space<vmem>>, %arg6: memref<1x64xf32, #tpu.memory_space<vmem>>, %arg7: memref<1x64xf32, #tpu.memory_space<vmem>>, %arg8: memref<1x2x32x64xbf16, #tpu.memory_space<vmem>>, %arg9: memref<1x2x64x32xbf16, #tpu.memory_space<vmem>>) attributes {dimension_semantics = [#tpu.dimension_semantics<parallel>], iteration_bounds = array<i64: 2>, scalar_prefetch = 0 : i64, scratch_operands = 0 : i64, tpu.core_type = #tpu.core_type<tc>, window_params = [{transform_indices = @transform_0, window_bounds = array<i64: 1, 8, 2, 8, 128>}, {pipeline_mode = #tpu.pipeline_mode<synchronous>, transform_indices = @transform_1, window_bounds = array<i64: 2, 128, 64>}, {pipeline_mode = #tpu.pipeline_mode<synchronous>, transform_indices = @transform_2, window_bounds = array<i64: 1, 64>}, {pipeline_mode = #tpu.pipeline_mode<synchronous>, transform_indices = @transform_3, window_bounds = array<i64: 64, 64>}, {pipeline_mode = #tpu.pipeline_mode<synchronous>, transform_indices = @transform_4, window_bounds = array<i64: 64, 64>}, {pipeline_mode = #tpu.pipeline_mode<synchronous>, transform_indices = @transform_5, window_bounds = array<i64: 1, 64>}, {pipeline_mode = #tpu.pipeline_mode<synchronous>, transform_indices = @transform_6, window_bounds = array<i64: 1, 64>}, {transform_indices = @transform_7, window_bounds = array<i64: 1, 2, 32, 64>}, {transform_indices = @transform_8, window_bounds = array<i64: 1, 2, 64, 32>}]} {
    %c0 = arith.constant 0 : index
    %c0_0 = arith.constant 0 : index
    %c0_1 = arith.constant 0 : index
    %c0_2 = arith.constant 0 : index
    %c0_3 = arith.constant 0 : index
    %0 = vector.load %arg1[%c0, %c0_0, %c0_1, %c0_2, %c0_3] : memref<1x8x2x8x128xbf16, #tpu.memory_space<vmem>>, vector<1x8x2x8x128xbf16>
    %1 = vector.shape_cast %0 : vector<1x8x2x8x128xbf16> to vector<8x2x8x128xbf16>
    %2 = vector.extract_strided_slice %1 {offsets = [0, 0, 0, 0], sizes = [8, 1, 8, 128], strides = [1, 1, 1, 1]} : vector<8x2x8x128xbf16> to vector<8x1x8x128xbf16>
    %3 = vector.shape_cast %2 : vector<8x1x8x128xbf16> to vector<8x8x128xbf16>
    %4 = vector.shape_cast %3 : vector<8x8x128xbf16> to vector<64x128xbf16>
    %c0_4 = arith.constant 0 : index
    %c0_5 = arith.constant 0 : index
    %c0_6 = arith.constant 0 : index
    %5 = vector.load %arg2[%c0_4, %c0_5, %c0_6] : memref<2x128x64xbf16, #tpu.memory_space<vmem>>, vector<1x128x64xbf16>
    %6 = vector.shape_cast %5 : vector<1x128x64xbf16> to vector<128x64xbf16>
    %cst = arith.constant dense<0.000000e+00> : vector<64x64xf32>
    %7 = tpu.matmul %4, %6, %cst {dimension_numbers = #tpu.dot_dimension_numbers<[1], [0], [0], [1], [0, 0, 1, 1], [], []>} : vector<64x128xbf16>, vector<128x64xbf16>, vector<64x64xf32> -> vector<64x64xf32>
    %8 = vector.extract_strided_slice %1 {offsets = [0, 1, 0, 0], sizes = [8, 1, 8, 128], strides = [1, 1, 1, 1]} : vector<8x2x8x128xbf16> to vector<8x1x8x128xbf16>
    %9 = vector.shape_cast %8 : vector<8x1x8x128xbf16> to vector<8x8x128xbf16>
    %10 = vector.shape_cast %9 : vector<8x8x128xbf16> to vector<64x128xbf16>
    %c1 = arith.constant 1 : index
    %c0_7 = arith.constant 0 : index
    %c0_8 = arith.constant 0 : index
    %11 = vector.load %arg2[%c1, %c0_7, %c0_8] : memref<2x128x64xbf16, #tpu.memory_space<vmem>>, vector<1x128x64xbf16>
    %12 = vector.shape_cast %11 : vector<1x128x64xbf16> to vector<128x64xbf16>
    %cst_9 = arith.constant dense<0.000000e+00> : vector<64x64xf32>
    %13 = tpu.matmul %10, %12, %cst_9 {dimension_numbers = #tpu.dot_dimension_numbers<[1], [0], [0], [1], [0, 0, 1, 1], [], []>} : vector<64x128xbf16>, vector<128x64xbf16>, vector<64x64xf32> -> vector<64x64xf32>
    %14 = arith.addf %7, %13 : vector<64x64xf32>
    %c0_10 = arith.constant 0 : index
    %c0_11 = arith.constant 0 : index
    %15 = vector.load %arg3[%c0_10, %c0_11] : memref<1x64xf32, #tpu.memory_space<vmem>>, vector<1x64xf32>
    %16 = vector.broadcast %15 : vector<1x64xf32> to vector<64x64xf32>
    %17 = arith.addf %14, %16 : vector<64x64xf32>
    %cst_12 = arith.constant dense<0.000000e+00> : vector<64xf32>
    %18 = vector.multi_reduction <add>, %17, %cst_12 [1] : vector<64x64xf32> to vector<64xf32>
    %19 = vector.shape_cast %18 : vector<64xf32> to vector<64x1xf32>
    %cst_13 = arith.constant 6.400000e+01 : f32
    %20 = vector.broadcast %cst_13 : f32 to vector<64x1xf32>
    %21 = arith.divf %19, %20 : vector<64x1xf32>
    %22 = vector.broadcast %21 : vector<64x1xf32> to vector<64x64xf32>
    %23 = arith.subf %17, %22 : vector<64x64xf32>
    %24 = arith.mulf %23, %23 : vector<64x64xf32>
    %cst_14 = arith.constant dense<0.000000e+00> : vector<64xf32>
    %25 = vector.multi_reduction <add>, %24, %cst_14 [1] : vector<64x64xf32> to vector<64xf32>
    %26 = vector.shape_cast %25 : vector<64xf32> to vector<64x1xf32>
    %cst_15 = arith.constant 6.400000e+01 : f32
    %27 = vector.broadcast %cst_15 : f32 to vector<64x1xf32>
    %28 = arith.divf %26, %27 : vector<64x1xf32>
    %29 = vector.broadcast %21 : vector<64x1xf32> to vector<64x64xf32>
    %30 = arith.subf %17, %29 : vector<64x64xf32>
    %cst_16 = arith.constant 9.99999974E-6 : f32
    %31 = vector.broadcast %cst_16 : f32 to vector<64x1xf32>
    %32 = arith.addf %28, %31 : vector<64x1xf32>
    %33 = math.rsqrt %32 : vector<64x1xf32>
    %34 = vector.broadcast %33 : vector<64x1xf32> to vector<64x64xf32>
    %35 = arith.mulf %30, %34 : vector<64x64xf32>
    %36 = arith.truncf %35 : vector<64x64xf32> to vector<64x64xbf16>
    %c0_17 = arith.constant 0 : index
    %c0_18 = arith.constant 0 : index
    %37 = vector.load %arg4[%c0_17, %c0_18] : memref<64x64xbf16, #tpu.memory_space<vmem>>, vector<64x64xbf16>
    %cst_19 = arith.constant dense<0.000000e+00> : vector<64x64xf32>
    %38 = tpu.matmul %36, %37, %cst_19 {dimension_numbers = #tpu.dot_dimension_numbers<[1], [0], [0], [1], [0, 0, 1, 1], [], []>} : vector<64x64xbf16>, vector<64x64xbf16>, vector<64x64xf32> -> vector<64x64xf32>
    %c0_20 = arith.constant 0 : index
    %c0_21 = arith.constant 0 : index
    %39 = vector.load %arg6[%c0_20, %c0_21] : memref<1x64xf32, #tpu.memory_space<vmem>>, vector<1x64xf32>
    %40 = vector.broadcast %39 : vector<1x64xf32> to vector<64x64xf32>
    %41 = arith.addf %38, %40 : vector<64x64xf32>
    %c0_22 = arith.constant 0 : index
    %c0_23 = arith.constant 0 : index
    %42 = vector.load %arg5[%c0_22, %c0_23] : memref<64x64xbf16, #tpu.memory_space<vmem>>, vector<64x64xbf16>
    %cst_24 = arith.constant dense<0.000000e+00> : vector<64x64xf32>
    %43 = tpu.matmul %36, %42, %cst_24 {dimension_numbers = #tpu.dot_dimension_numbers<[1], [0], [0], [1], [0, 0, 1, 1], [], []>} : vector<64x64xbf16>, vector<64x64xbf16>, vector<64x64xf32> -> vector<64x64xf32>
    %c0_25 = arith.constant 0 : index
    %c0_26 = arith.constant 0 : index
    %44 = vector.load %arg7[%c0_25, %c0_26] : memref<1x64xf32, #tpu.memory_space<vmem>>, vector<1x64xf32>
    %45 = vector.broadcast %44 : vector<1x64xf32> to vector<64x64xf32>
    %46 = arith.addf %43, %45 : vector<64x64xf32>
    %47 = arith.truncf %41 : vector<64x64xf32> to vector<64x64xbf16>
    %48 = tpu.transpose %47, [1, 0] : vector<64x64xbf16> -> vector<64x64xbf16>
    %49 = vector.shape_cast %48 : vector<64x64xbf16> to vector<2x32x64xbf16>
    %c0_27 = arith.constant 0 : index
    %c0_28 = arith.constant 0 : index
    %c0_29 = arith.constant 0 : index
    %c0_30 = arith.constant 0 : index
    %50 = vector.load %arg8[%c0_27, %c0_28, %c0_29, %c0_30] : memref<1x2x32x64xbf16, #tpu.memory_space<vmem>>, vector<1x2x32x64xbf16>
    %51 = vector.shape_cast %50 : vector<1x2x32x64xbf16> to vector<2x32x64xbf16>
    %52 = vector.shape_cast %49 : vector<2x32x64xbf16> to vector<1x2x32x64xbf16>
    tpu.vector_store %arg8[%c0_27, %c0_28, %c0_29, %c0_30], %52 {strides = array<i32>} : memref<1x2x32x64xbf16, #tpu.memory_space<vmem>>, vector<1x2x32x64xbf16>,
    %53 = arith.truncf %46 : vector<64x64xf32> to vector<64x64xbf16>
    %54 = vector.shape_cast %53 : vector<64x64xbf16> to vector<64x2x32xbf16>
    %55 = tpu.transpose %54, [1, 0, 2] : vector<64x2x32xbf16> -> vector<2x64x32xbf16>
    %c0_31 = arith.constant 0 : index
    %c0_32 = arith.constant 0 : index
    %c0_33 = arith.constant 0 : index
    %c0_34 = arith.constant 0 : index
    %56 = vector.load %arg9[%c0_31, %c0_32, %c0_33, %c0_34] : memref<1x2x64x32xbf16, #tpu.memory_space<vmem>>, vector<1x2x64x32xbf16>
    %57 = vector.shape_cast %56 : vector<1x2x64x32xbf16> to vector<2x64x32xbf16>
    %58 = vector.shape_cast %55 : vector<2x64x32xbf16> to vector<1x2x64x32xbf16>
    tpu.vector_store %arg9[%c0_31, %c0_32, %c0_33, %c0_34], %58 {strides = array<i32>} : memref<1x2x64x32xbf16, #tpu.memory_space<vmem>>, vector<1x2x64x32xbf16>,
    return
  }
  func.func @transform_0(%arg0: i32) -> (i32, i32, i32, i32, i32) {
    %c0_i32 = arith.constant 0 : i32
    %c0_i32_0 = arith.constant 0 : i32
    %c0_i32_1 = arith.constant 0 : i32
    %c0_i32_2 = arith.constant 0 : i32
    %c0_i32_3 = arith.constant 0 : i32
    return %arg0, %c0_i32, %c0_i32_0, %c0_i32_1, %c0_i32_2 : i32, i32, i32, i32, i32
  }
  func.func @transform_1(%arg0: i32) -> (i32, i32, i32) {
    %c0_i32 = arith.constant 0 : i32
    %c0_i32_0 = arith.constant 0 : i32
    %c0_i32_1 = arith.constant 0 : i32
    %c0_i32_2 = arith.constant 0 : i32
    return %c0_i32, %c0_i32_0, %c0_i32_1 : i32, i32, i32
  }
  func.func @transform_2(%arg0: i32) -> (i32, i32) {
    %c0_i32 = arith.constant 0 : i32
    %c0_i32_0 = arith.constant 0 : i32
    %c0_i32_1 = arith.constant 0 : i32
    return %c0_i32, %c0_i32_0 : i32, i32
  }
  func.func @transform_3(%arg0: i32) -> (i32, i32) {
    %c0_i32 = arith.constant 0 : i32
    %c0_i32_0 = arith.constant 0 : i32
    %c0_i32_1 = arith.constant 0 : i32
    return %c0_i32, %c0_i32_0 : i32, i32
  }
  func.func @transform_4(%arg0: i32) -> (i32, i32) {
    %c0_i32 = arith.constant 0 : i32
    %c0_i32_0 = arith.constant 0 : i32
    %c0_i32_1 = arith.constant 0 : i32
    return %c0_i32, %c0_i32_0 : i32, i32
  }
  func.func @transform_5(%arg0: i32) -> (i32, i32) {
    %c0_i32 = arith.constant 0 : i32
    %c0_i32_0 = arith.constant 0 : i32
    %c0_i32_1 = arith.constant 0 : i32
    return %c0_i32, %c0_i32_0 : i32, i32
  }
  func.func @transform_6(%arg0: i32) -> (i32, i32) {
    %c0_i32 = arith.constant 0 : i32
    %c0_i32_0 = arith.constant 0 : i32
    %c0_i32_1 = arith.constant 0 : i32
    return %c0_i32, %c0_i32_0 : i32, i32
  }
  func.func @transform_7(%arg0: i32) -> (i32, i32, i32, i32) {
    %c0_i32 = arith.constant 0 : i32
    %c0_i32_0 = arith.constant 0 : i32
    %c0_i32_1 = arith.constant 0 : i32
    %c0_i32_2 = arith.constant 0 : i32
    return %arg0, %c0_i32, %c0_i32_0, %c0_i32_1 : i32, i32, i32, i32
  }
  func.func @transform_8(%arg0: i32) -> (i32, i32, i32, i32) {
    %c0_i32 = arith.constant 0 : i32
    %c0_i32_0 = arith.constant 0 : i32
    %c0_i32_1 = arith.constant 0 : i32
    %c0_i32_2 = arith.constant 0 : i32
    return %arg0, %c0_i32, %c0_i32_0, %c0_i32_1 : i32, i32, i32, i32
  }
}

</mosaic_0001>

<bundles_post_ra>
// kernel: tpu_custom_call.1
= control target key start
LH: loop header
LB: loop body
LE: loop exit
PB: predicated region body
PF: predicated region fallthrough
CT: control target
= control target key end

     0   :  { %14 = vsyncpa [#allocation3], 0  ;;  %s3012_s0 = inlined_call_operand.vmem [shape: bf16[2,8,2,8,128], index: 0, kind: input, shape index: {}]   ;;  %s3013_s1 = inlined_call_operand.vmem [shape: bf16[2,128,64], index: 1, kind: input, shape index: {}]   ;;  %s3014_s2 = inlined_call_operand.vmem [shape: f32[1,64], index: 2, kind: input, shape index: {}]   ;;  %s3015_s3 = inlined_call_operand.vmem [shape: bf16[64,64], index: 3, kind: input, shape index: {}]   ;;  %s3016_s4 = inlined_call_operand.vmem [shape: bf16[64,64], index: 4, kind: input, shape index: {}]   ;;  %s3017_s5 = inlined_call_operand.vmem [shape: f32[1,64], index: 5, kind: input, shape index: {}]   ;;  %s3018_s6 = inlined_call_operand.vmem [shape: f32[1,64], index: 6, kind: input, shape index: {}]   ;;  %s3019_s7 = inlined_call_operand.hbm [shape: bf16[2,2,32,64], index: 7, kind: output, shape index: {0}]   ;;  %s3020_s8 = inlined_call_operand.vmem [shape: bf16[2,2,64,32], index: 8, kind: output, shape index: {1}]  }
   0x1   :  { %16 = vsyncpa [#allocation3 + $0x1], 0  ;;  %s2522_s27 = smov 0   ;;  %s2524_s28 = smov 0  }
   0x2   :  { %s2526_s29 = smov 0   ;;  %s2528_s30 = smov 0  }
   0x3 LB: > { %s2543_s9 = sadd.s32 4294967295, %s2468_s30   ;;  %s2079_s10 = sadd.s32 4294967294, %s2468_s30   ;;  %s2468_s30 = sphi %s2528_s30, %s3026_s30   ;;  %s2464_s29 = sphi %s2526_s29, %s3025_s29   ;;  %s2460_s28 = sphi %s2524_s28, %s3024_s28   ;;  %s2456_s27 = sphi %s2522_s27, %s3023_s27  }
   0x4   : > { %s2547_s11 = sadd.s32 1, %s2468_s30   ;;  %s181_s12 = sadd.s32 1, %s2464_s29 }
   0x5   : > { %s178_s13 = ssub.s32 %s2468_s30, %s2547_s11  ;;  %p191_p0 = scmp.ne.s32.totalorder %s2464_s29, %s2460_s28 }
   0x6   : > { %p179_p1 = scmp.eq.s32.totalorder %s178_s13, 0  ;;  %p192_p2 = scmp.eq.s32.totalorder %s2543_s9, 1 }
   0x7   : > { %p197_p3 = scmp.ne.s32.totalorder %s2460_s28, %s2456_s27  ;;  %p198_p4 = scmp.eq.s32.totalorder %s2079_s10, 1 }
   0x8   : > { %s2558_s14 = scalar_select %p179_p1, %s2464_s29, %s181_s12  }
   0x9   : > { %p2560_p5 = por %p192_p2, %p191_p0  ;;  %p2564_p6 = por %p198_p4, %p197_p3 }
   0xa   : > { %p2082_p7 = scmp.ge.s32.totalorder %s2468_s30, 1  ;;  %p268_p8 = scmp.lt.s32.totalorder %s2468_s30, 3 }
   0xc   : > { %p269_p9 = pnand %p2082_p7, %p268_p8 }
   0xd   : > { %p307_p10 = scmp.lt.s32.totalorder (!%p269_p9), %s2543_s9, 1  ;;  %s2470_s17 = smov (!%p269_p9), 96  }
   0xe   : > { %272 = sbr.rel (%p269_p9) target bundleno = 964 (0x3c4), region = 48  ;;  %s2194_s24 = sshll.u32 (!%p269_p9), %s2543_s9, 9 }
   0xf   : > { %s2938_s10 = scalar_lea.hbm (!%p269_p9), %s3019_s7, %s2194_s24  ;;  %s2474_s19 = smov (!%p269_p9), [#allocation2]  }
  0x10   : > { %s2412_s20 = sshll.u32 (!%p269_p9), %s2474_s19, 4  ;;  %s2413_s20 = int_to_ptr.vmem [resolvable:$false] %s2412_s20 }
  0x13   : > { %v2360_v0 = vld [vmem:[%s3013_s1 + $0x78] sm:$0xff]   ;;  %v2362_v2 = vld [vmem:[%s3013_s1 + $0x70] sm:$0xff]   ;;  %v2364_v4 = vld [vmem:[%s3013_s1 + $0x68] sm:$0xff]   ;;  %s2590_s13 = scalar_select %p307_p10, %s2543_s9, 1  ;;  %vm656_vm0 = vcmask 523264   ;;  %vm1953_vm1 = vcmask 257024  }
  0x14   : > { %v2361_v1 = vld [vmem:[%s3013_s1 + $0x38] sm:$0xff]   ;;  %2235 = vmatprep.subr.bf16.mxu0 %v2360_v0  ;;  %v2363_v3 = vld [vmem:[%s3013_s1 + $0x30] sm:$0xff]   ;;  %v2365_v5 = vld [vmem:[%s3013_s1 + $0x28] sm:$0xff]   ;;  %vm1034_vm2 = vcmask 519168  }
  0x15   : > { %2259 = vmatprep.subr.bf16.mxu1 %v2361_v1  ;;  %2236 = vmatpush3.bf16.msra.mxu0 %v2360_v0  ;;  %v2366_v6 = vld [vmem:[%s3013_s1 + $0x60] sm:$0xff]   ;;  %s2192_s21 = sshll.u32 %s2590_s13, 6  ;;  %v2368_v8 = vld [vmem:[%s3013_s1 + $0x58] sm:$0xff]   ;;  %v2370_v10 = vld [vmem:[%s3013_s1 + $0x50] sm:$0xff]   ;;  %s297_s13 = sand.u32 1, %s2460_s28  }
  0x16   : > { %2260 = vmatpush3.bf16.msra.mxu1 %v2361_v1  ;;  %2237 = vmatprep.subr.bf16.mxu0 %v2362_v2  ;;  %v2367_v7 = vld [vmem:[%s3013_s1 + $0x20] sm:$0xff]   ;;  %v2369_v9 = vld [vmem:[%s3013_s1 + $0x18] sm:$0xff]   ;;  %s2610_s12 = scalar_lea.vmem %s3012_s0, %s2192_s21  ;;  %v2371_v11 = vld [vmem:[%s3013_s1 + $0x10] sm:$0xff]   ;;  %s2814_s22 = scalar_lea.vmem %s3020_s8, %s2192_s21 }
  0x17   : > { %2261 = vmatprep.subr.bf16.mxu1 %v2363_v3  ;;  %v2376_v12 = vld [vmem:[%s2610_s12 + $0x4] ss:$8 sps:$4 sm:$0xff]   ;;  %v2377_v13 = vld [vmem:[%s2610_s12] ss:$8 sps:$4 sm:$0xff]   ;;  %v2378_v18 = vld [vmem:[%s2610_s12 + $0x14] ss:$8 sps:$4 sm:$0xff]  }
  0x18   : > { %2251 = vmatprep.mubr.bf16.mxu0 %v2376_v12  ;;  %2275 = vmatprep.mubr.bf16.mxu1 %v2377_v13  ;;  %v2372_v14 = vld [vmem:[%s3013_s1 + $0x48] sm:$0xff]   ;;  %v2374_v16 = vld [vmem:[%s3013_s1 + $0x40] sm:$0xff]   ;;  %v2379_v19 = vld [vmem:[%s2610_s12 + $0x10] ss:$8 sps:$4 sm:$0xff]   ;;  %s2083_s21 = sshll.u32 %s297_s13, 5 }
  0x19   : > { %2238 = vmatpush3.bf16.msra.mxu0 %v2362_v2  ;;  %v2373_v15 = vld [vmem:[%s3013_s1 + $0x8] sm:$0xff]   ;;  %v2375_v17 = vld [vmem:[%s3013_s1] sm:$0xff]   ;;  %v2382_v22 = vld [vmem:[%s2610_s12 + $0x34] ss:$8 sps:$4 sm:$0xff]   ;;  %s2904_s23 = scalar_lea.vmem [#allocation2], %s2083_s21 }
  0x1a   : > { %2262 = vmatpush3.bf16.msra.mxu1 %v2363_v3  ;;  %2239 = vmatprep.subr.bf16.mxu0 %v2364_v4  ;;  %v2380_v20 = vld [vmem:[%s2610_s12 + $0x24] ss:$8 sps:$4 sm:$0xff]   ;;  %v2381_v21 = vld [vmem:[%s2610_s12 + $0x20] ss:$8 sps:$4 sm:$0xff]   ;;  %v2383_v23 = vld [vmem:[%s2610_s12 + $0x30] ss:$8 sps:$4 sm:$0xff]  }
  0x1b   : > { %2263 = vmatprep.subr.bf16.mxu1 %v2365_v5  ;;  %v2128_v26 = vld [vmem:[%s3014_s2] ss:$0 sm:$0xff]  ;;  %s1989_s25 = sshll.u32 %s2904_s23, 4  ;;  %s2414_s12 = scalar_lea.vmem %s2413_s20, 1024  ;;  %s2940_s25 = int_to_ptr.vmem [resolvable:$true] %s1989_s25 }
  0x1c   : > { %s2408_s18 = scalar_lea.vmem %s2940_s25, 512  ;;  %p2415_p0 = scmp.lt.s32.totalorder %s2940_s25, %s2413_s20 }
  0x1d   : > { %2240 = vmatpush3.bf16.msra.mxu0 %v2364_v4  ;;  %p2409_p11 = scmp.ne.s32.totalorder %s2940_s25, %s2408_s18  ;;  %p2416_p1 = scmp.lt.s32.totalorder %s2414_s12, %s2408_s18 }
  0x1e   : > { %2264 = vmatpush3.bf16.msra.mxu1 %v2365_v5  ;;  %2241 = vmatprep.subr.bf16.mxu0 %v2366_v6 }
  0x1f   : > { %2265 = vmatprep.subr.bf16.mxu1 %v2367_v7  ;;  %p2410_p12 = pnand %p2409_p11, %p2560_p5  ;;  %p2417_p2 = por %p2416_p1, %p2415_p0 }
  0x21   : > { %2242 = vmatpush3.bf16.msra.mxu0 %v2366_v6  ;;  %p2411_p13 = pneg %p2410_p12 }
  0x22   : > { %2266 = vmatpush3.bf16.msra.mxu1 %v2367_v7  ;;  %2243 = vmatprep.subr.bf16.mxu0 %v2368_v8 }
  0x23   : > { %2267 = vmatprep.subr.bf16.mxu1 %v2369_v9  ;;  %p2418_p3 = pnand %p2417_p2, %p2411_p13 }
  0x25   : > { %2244 = vmatpush3.bf16.msra.mxu0 %v2368_v8 }
  0x26   : > { %2268 = vmatpush3.bf16.msra.mxu1 %v2369_v9  ;;  %2245 = vmatprep.subr.bf16.mxu0 %v2370_v10 }
  0x27   : > { %2269 = vmatprep.subr.bf16.mxu1 %v2371_v11 }
  0x29   : > { %2246 = vmatpush3.bf16.msra.mxu0 %v2370_v10 }
  0x2a   : > { %2270 = vmatpush3.bf16.msra.mxu1 %v2371_v11  ;;  %2247 = vmatprep.subr.bf16.mxu0 %v2372_v14 }
  0x2b   : > { %2271 = vmatprep.subr.bf16.mxu1 %v2373_v15 }
  0x2d   : > { %2248 = vmatpush3.bf16.msra.mxu0 %v2372_v14 }
  0x2e   : > { %2272 = vmatpush3.bf16.msra.mxu1 %v2373_v15  ;;  %2249 = vmatprep.subr.bf16.mxu0 %v2374_v16 }
  0x2f   : > { %2273 = vmatprep.subr.bf16.mxu1 %v2375_v17 }
  0x31   : > { %2250 = vmatpush3.bf16.msra.mxu0 %v2374_v16 }
  0x32   : > { %2274 = vmatpush3.bf16.msra.mxu1 %v2375_v17 }
  0x34   : > { %2252 = vmatmul.mubr.bf16.vlgmr.msra.gmra.mxu0 %v2378_v18 }
  0x35   : > { %2276 = vmatmul.mubr.bf16.vlgmr.msra.gmra.mxu1 %v2379_v19  ;;  %2255 = vmatprep.mubr.bf16.mxu0 %v2380_v20 }
  0x36   : > { %2279 = vmatprep.mubr.bf16.mxu1 %v2381_v21 }
  0x3c   : > { %2256 = vmatmul.mubr.bf16.gmra.mxu0 %v2382_v22 }
  0x3d   : > { %2280 = vmatmul.mubr.bf16.gmra.mxu1 %v2383_v23 }
  0xf4   : > { %v2253_v24 = vpop.f32.mrf.mxu0 }
  0xf5   : > { %v2277_v25 = vpop.f32.mrf.mxu1 }
  0xf6   : > { %v619_v27 = vadd.f32 %v2277_v25, %v2253_v24  ;;  %v473_v28 = vpop.f32.mrf.mxu0 }
  0xf7   : > { %v610_v29 = vpop.f32.mrf.mxu1 }
  0xf8   : > { %v611_v30 = vadd.f32 %v610_v29, %v473_v28  ;;  %v2254_v31 = vpop.f32.mrf.mxu0  ;;  %v650_v32 = vadd.f32 %v2128_v26, %v619_v27 }
  0xf9   : > { %v2278_v33 = vpop.f32.mrf.mxu1 }
  0xfa   : > { %v622_v34 = vadd.f32 %v2278_v33, %v2254_v31  ;;  %v476_v35 = vpop.f32.mrf.mxu0  ;;  %v663_v36 = vsel %vm656_vm0, %v650_v32, 0.0  ;;  %v648_v37 = vadd.f32 %v2128_v26, %v611_v30 }
  0xfb   : > { %664 = vadd.xlane.f32.xlu1 %v663_v36  ;;  %v613_v38 = vpop.f32.mrf.mxu1 }
  0xfc   : > { %v614_v39 = vadd.f32 %v613_v38, %v476_v35  ;;  %v2257_v40 = vpop.f32.mrf.mxu0  ;;  %v657_v41 = vsel %vm656_vm0, %v648_v37, 0.0  ;;  %v651_v42 = vadd.f32 %v2128_v26, %v622_v34 }
  0xfd   : > { %v2281_v43 = vpop.f32.mrf.mxu1  ;;  %658 = vadd.xlane.f32.xlu0 %v657_v41  ;;  %v2384_v41 = vld [vmem:[%s3016_s4 + $0x18] sm:$0xff]  }
  0xfe   : > { %v489_v44 = vpop.f32.mrf.mxu0  ;;  %v666_v45 = vsel %vm656_vm0, %v651_v42, 0.0  ;;  %v649_v46 = vadd.f32 %v2128_v26, %v614_v39  ;;  %v635_v48 = vadd.f32 %v2281_v43, %v2257_v40  ;;  %2299 = vmatprep.subr.bf16.mxu1 %v2384_v41  ;;  %v2386_v43 = vld [vmem:[%s3016_s4 + $0x10] sm:$0xff]  }
  0xff   : > { %667 = vadd.xlane.f32.xlu1 %v666_v45  ;;  %v626_v47 = vpop.f32.mrf.mxu1  ;;  %2300 = vmatpush3.bf16.msra.mxu1 %v2384_v41  ;;  %v2388_v45 = vld [vmem:[%s3016_s4 + $0x8] sm:$0xff]  }
 0x100   : > { %v627_v49 = vadd.f32 %v626_v47, %v489_v44  ;;  %v2258_v50 = vpop.f32.mrf.mxu0  ;;  %v660_v51 = vsel %vm656_vm0, %v649_v46, 0.0  ;;  %v654_v59 = vadd.f32 %v2128_v26, %v635_v48  ;;  %v2387_v44 = vld [vmem:[%s3015_s3 + $0x10] sm:$0xff]   ;;  %2301 = vmatprep.subr.bf16.mxu1 %v2386_v43  ;;  %v2390_v47 = vld [vmem:[%s3016_s4] sm:$0xff]  }
 0x101   : > { %v2282_v52 = vpop.f32.mrf.mxu1  ;;  %661 = vadd.xlane.f32.xlu0 %v660_v51  ;;  %v2391_v48 = vld [vmem:[%s3015_s3] sm:$0xff]  }
 0x102   : > { %v492_v53 = vpop.f32.mrf.mxu0  ;;  %v652_v54 = vadd.f32 %v2128_v26, %v627_v49  ;;  %v638_v56 = vadd.f32 %v2282_v52, %v2258_v50  ;;  %v675_v62 = vsel %vm656_vm0, %v654_v59, 0.0 }
 0x103   : > { %v629_v55 = vpop.f32.mrf.mxu1  ;;  %2302 = vmatpush3.bf16.msra.mxu1 %v2386_v43 }
 0x104   : > { %v630_v57 = vadd.f32 %v629_v55, %v492_v53  ;;  %v669_v58 = vsel %vm656_vm0, %v652_v54, 0.0  ;;  %v655_v63 = vadd.f32 %v2128_v26, %v638_v56  ;;  %2303 = vmatprep.subr.bf16.mxu1 %v2388_v45 }
 0x105   : > { %670 = vadd.xlane.f32.xlu0 %v669_v58 }
 0x106   : > { %v653_v60 = vadd.f32 %v2128_v26, %v630_v57  ;;  %v678_v0 = vsel %vm656_vm0, %v655_v63, 0.0 }
 0x107   : > { %2304 = vmatpush3.bf16.msra.mxu1 %v2388_v45 }
 0x108   : > { %v672_v61 = vsel %vm656_vm0, %v653_v60, 0.0  ;;  %2305 = vmatprep.subr.bf16.mxu1 %v2390_v47 }
 0x109   : > { %673 = vadd.xlane.f32.xlu1 %v672_v61  ;;  %676 = vadd.xlane.f32.xlu0 %v675_v62 }
 0x10b   : > { %2306 = vmatpush3.bf16.msra.mxu1 %v2390_v47 }
 0x10d   : > { %679 = vadd.xlane.f32.xlu1 %v678_v0 }
 0x184   : > { %v665_v1 = vpop.xlane.xlu1 %664 }
 0x185   : > { %v684_v2 = vmul.f32 0.015625, %v665_v1 }
 0x186   : > { %v659_v3 = vpop.xlane.xlu0 %658 }
 0x187   : > { %v682_v4 = vmul.f32 0.015625, %v659_v3  ;;  %v2649_v6 = vsub.f32 %v650_v32, %v684_v2 }
 0x188   : > { %v668_v5 = vpop.xlane.xlu1 %667 }
 0x189   : > { %v2651_v7 = vsub.f32 %v648_v37, %v682_v4  ;;  %v685_v8 = vmul.f32 0.015625, %v668_v5  ;;  %v700_v15 = vmul.f32 %v2649_v6, %v2649_v6 }
 0x18a   : > { %v662_v9 = vpop.xlane.xlu0 %661 }
 0x18b   : > { %v683_v10 = vmul.f32 0.015625, %v662_v9  ;;  %v698_v11 = vmul.f32 %v2651_v7, %v2651_v7  ;;  %v2655_v12 = vsub.f32 %v651_v42, %v685_v8  ;;  %v712_v20 = vsel %vm656_vm0, %v700_v15, 0.0  ;;  %v2385_v42 = vld [vmem:[%s3015_s3 + $0x18] sm:$0xff]  }
 0x18c   : > { %2283 = vmatprep.subr.bf16.mxu0 %v2385_v42 }
 0x18d   : > { %v2657_v13 = vsub.f32 %v649_v46, %v683_v10  ;;  %v706_v14 = vsel %vm656_vm0, %v698_v11, 0.0  ;;  %v701_v22 = vmul.f32 %v2655_v12, %v2655_v12  ;;  %2284 = vmatpush3.bf16.msra.mxu0 %v2385_v42  ;;  %v2389_v46 = vld [vmem:[%s3015_s3 + $0x8] sm:$0xff]  }
 0x18e   : > { %707 = vadd.xlane.f32.xlu0 %v706_v14  ;;  %v671_v16 = vpop.xlane.xlu0 %670  ;;  %2285 = vmatprep.subr.bf16.mxu0 %v2387_v44 }
 0x18f   : > { %v686_v17 = vmul.f32 0.015625, %v671_v16  ;;  %v699_v18 = vmul.f32 %v2657_v13, %v2657_v13  ;;  %v715_v30 = vsel %vm656_vm0, %v701_v22, 0.0 }
 0x191   : > { %v2664_v19 = vsub.f32 %v652_v54, %v686_v17  ;;  %v709_v21 = vsel %vm656_vm0, %v699_v18, 0.0  ;;  %2286 = vmatpush3.bf16.msra.mxu0 %v2387_v44 }
 0x192   : > { %v674_v23 = vpop.xlane.xlu1 %673  ;;  %713 = vadd.xlane.f32.xlu0 %v712_v20  ;;  %710 = vadd.xlane.f32.xlu1 %v709_v21  ;;  %v677_v24 = vpop.xlane.xlu0 %676 }
 0x193   : > { %v687_v25 = vmul.f32 0.015625, %v674_v23  ;;  %v688_v26 = vmul.f32 0.015625, %v677_v24  ;;  %v702_v27 = vmul.f32 %v2664_v19, %v2664_v19  ;;  %2287 = vmatprep.subr.bf16.mxu0 %v2389_v46 }
 0x195   : > { %v2672_v28 = vsub.f32 %v653_v60, %v687_v25  ;;  %v2674_v29 = vsub.f32 %v654_v59, %v688_v26  ;;  %v718_v31 = vsel %vm656_vm0, %v702_v27, 0.0  ;;  %2288 = vmatpush3.bf16.msra.mxu0 %v2389_v46 }
 0x196   : > { %v680_v32 = vpop.xlane.xlu1 %679  ;;  %716 = vadd.xlane.f32.xlu1 %v715_v30  ;;  %719 = vadd.xlane.f32.xlu0 %v718_v31 }
 0x197   : > { %v689_v33 = vmul.f32 0.015625, %v680_v32  ;;  %v703_v34 = vmul.f32 %v2672_v28, %v2672_v28  ;;  %v704_v35 = vmul.f32 %v2674_v29, %v2674_v29  ;;  %2289 = vmatprep.subr.bf16.mxu0 %v2391_v48 }
 0x199   : > { %v2682_v36 = vsub.f32 %v655_v63, %v689_v33  ;;  %v721_v37 = vsel %vm656_vm0, %v703_v34, 0.0  ;;  %v724_v38 = vsel %vm656_vm0, %v704_v35, 0.0  ;;  %2290 = vmatpush3.bf16.msra.mxu0 %v2391_v48 }
 0x19a   : > { %722 = vadd.xlane.f32.xlu1 %v721_v37  ;;  %725 = vadd.xlane.f32.xlu0 %v724_v38 }
 0x19b   : > { %v705_v39 = vmul.f32 %v2682_v36, %v2682_v36 }
 0x19d   : > { %v727_v40 = vsel %vm656_vm0, %v705_v39, 0.0 }
 0x19e   : > { %728 = vadd.xlane.f32.xlu1 %v727_v40 }
 0x217   : > { %v708_v49 = vpop.xlane.xlu0 %707 }
 0x218   : > { %v730_v50 = vmul.f32 0.015625, %v708_v49 }
 0x21a   : > { %v738_v51 = vadd.f32 1e-05, %v730_v50 }
 0x21b   : > { %v711_v52 = vpop.xlane.xlu1 %710  ;;  %v714_v53 = vpop.xlane.xlu0 %713 }
 0x21c   : > { %v731_v54 = vmul.f32 0.015625, %v711_v52  ;;  %v732_v55 = vmul.f32 0.015625, %v714_v53  ;;  %2392 = vrsqrt.f32 %v738_v51 }
 0x21e   : > { %v739_v56 = vadd.f32 1e-05, %v731_v54  ;;  %v740_v57 = vadd.f32 1e-05, %v732_v55 }
 0x21f   : > { %v717_v58 = vpop.xlane.xlu1 %716  ;;  %v720_v59 = vpop.xlane.xlu0 %719 }
 0x220   : > { %2394 = vrsqrt.f32 %v739_v56  ;;  %v733_v60 = vmul.f32 0.015625, %v717_v58  ;;  %v734_v61 = vmul.f32 0.015625, %v720_v59  ;;  %v2129_v56 = vld [vmem:[%s3017_s5] ss:$0 sm:$0xff] }
 0x221   : > { %2396 = vrsqrt.f32 %v740_v57 }
 0x222   : > { %v741_v62 = vadd.f32 1e-05, %v733_v60  ;;  %v742_v63 = vadd.f32 1e-05, %v734_v61 }
 0x223   : > { %v723_v0 = vpop.xlane.xlu1 %722  ;;  %v726_v1 = vpop.xlane.xlu0 %725 }
 0x224   : > { %2398 = vrsqrt.f32 %v741_v62  ;;  %v735_v2 = vmul.f32 0.015625, %v723_v0  ;;  %v736_v3 = vmul.f32 0.015625, %v726_v1 }
 0x225   : > { %2400 = vrsqrt.f32 %v742_v63 }
 0x226   : > { %v743_v4 = vadd.f32 1e-05, %v735_v2  ;;  %v744_v5 = vadd.f32 1e-05, %v736_v3 }
 0x227   : > { %v729_v8 = vpop.xlane.xlu1 %728 }
 0x228   : > { %2402 = vrsqrt.f32 %v743_v4  ;;  %v737_v9 = vmul.f32 0.015625, %v729_v8 }
 0x229   : > { %2404 = vrsqrt.f32 %v744_v5  ;;  %v2393_v11 = vpop.eup %2392 }
 0x22a   : > { %v745_v10 = vadd.f32 1e-05, %v737_v9  ;;  %v754_v15 = vmul.f32 %v2393_v11, %v2651_v7  ;;  %v2471_v9 = vmov 1983009808   ;;  %v1101_v11 = vlaneseq }
 0x22c   : > { %2406 = vrsqrt.f32 %v745_v10  ;;  %v1099_v10 = vunpack.c.l.s4 %v2471_v9 }
 0x22d   : > { %v2395_v14 = vpop.eup %2394 }
 0x22e   : > { %v755_v16 = vmul.f32 %v2395_v14, %v2657_v13  ;;  %v2397_v17 = vpop.eup %2396  ;;  %v2472_v14 = vmov 1934713408  }
 0x22f   : > { %v756_v21 = vmul.f32 %v2397_v17, %v2649_v6  ;;  %v1102_v17 = vshrl.u32 %v1101_v11, 7 }
 0x230   : > { %v762_v18 = vpack.c.bf16 %v755_v16, %v754_v15  ;;  %v1114_v15 = vunpack.c.l.s4 %v2472_v14  ;;  %v1100_v16 = vunpack.c.0.s8 %v1099_v10 }
 0x231   : > { %v2399_v20 = vpop.eup %2398 }
 0x232   : > { %v757_v22 = vmul.f32 %v2399_v20, %v2655_v12  ;;  %2291 = vmatprep.mubr.msk.bf16.mxu0 %vm656_vm0, %v762_v18  ;;  %2307 = vmatprep.mubr.msk.bf16.mxu1 %vm656_vm0, %v762_v18  ;;  %v2401_v23 = vpop.eup %2400  ;;  %v1115_v18 = vunpack.c.0.s8 %v1114_v15  ;;  %v2473_v20 = vmov 0  }
 0x233   : > { %v758_v7 = vmul.f32 %v2401_v23, %v2664_v19  ;;  %v2138_v19 = vld [vmem:[%s3018_s6] ss:$0 sm:$0xff] }
 0x234   : > { %v763_v24 = vpack.c.bf16 %v757_v22, %v756_v21  ;;  %v2746_v21 = vpack.i.b16 %v2473_v20, %v2473_v20  ;;  %v2748_v22 = vsub.s32 %v1100_v16, %v1102_v17 }
 0x235   : > { %v2403_v25 = vpop.eup %2402 }
 0x236   : > { %2292 = vmatmul.mubr.msk.bf16.vlgmr.msra.gmra.mxu0 %vm656_vm0, %v763_v24  ;;  %2308 = vmatmul.mubr.msk.bf16.vlgmr.msra.gmra.mxu1 %vm656_vm0, %v763_v24  ;;  %v759_v13 = vmul.f32 %v2403_v25, %v2672_v28  ;;  %v2405_v26 = vpop.eup %2404  ;;  %v2750_v24 = vsub.s32 %v1115_v18, %v1102_v17 }
 0x237   : > { %v760_v12 = vmul.f32 %v2405_v26, %v2674_v29 }
 0x238   : > { %v764_v27 = vpack.c.bf16 %v759_v13, %v758_v7 }
 0x239   : > { %v2407_v6 = vpop.eup %2406 }
 0x23a   : > { %2295 = vmatprep.mubr.msk.bf16.mxu0 %vm656_vm0, %v764_v27  ;;  %2311 = vmatprep.mubr.msk.bf16.mxu1 %vm656_vm0, %v764_v27  ;;  %v761_v30 = vmul.f32 %v2407_v6, %v2682_v36 }
 0x23c   : > { %v765_v31 = vpack.c.bf16 %v761_v30, %v760_v12 }
 0x23e   : > { %2296 = vmatmul.mubr.msk.bf16.gmra.mxu0 %vm656_vm0, %v765_v31  ;;  %2312 = vmatmul.mubr.msk.bf16.gmra.mxu1 %vm656_vm0, %v765_v31 }
 0x2f6   : > { %v2309_v32 = vpop.f32.mrf.mxu1  ;;  %v2293_v42 = vpop.f32.mrf.mxu0 }
 0x2f7   : > { %v964_v34 = vadd.f32 %v2309_v32, %v2138_v19  ;;  %v860_v63 = vadd.f32 %v2293_v42, %v2129_v56 }
 0x2f8   : > { %v955_v28 = vpop.f32.mrf.mxu1  ;;  %v851_v47 = vpop.f32.mrf.mxu0 }
 0x2f9   : > { %v956_v38 = vadd.f32 %v2138_v19, %v955_v28  ;;  %v852_v59 = vadd.f32 %v2129_v56, %v851_v47 }
 0x2fa   : > { %v2310_v33 = vpop.f32.mrf.mxu1  ;;  %v2294_v51 = vpop.f32.mrf.mxu0 }
 0x2fb   : > { %v967_v35 = vadd.f32 %v2310_v33, %v2138_v19  ;;  %v863_v60 = vadd.f32 %v2294_v51, %v2129_v56 }
 0x2fc   : > { %v958_v37 = vpop.f32.mrf.mxu1  ;;  %v854_v53 = vpop.f32.mrf.mxu0 }
 0x2fd   : > { %v1044_v39 = vpack.c.bf16 %v967_v35, %v964_v34  ;;  %v959_v29 = vadd.f32 %v2138_v19, %v958_v37  ;;  %v855_v57 = vadd.f32 %v2129_v56, %v854_v53  ;;  %v987_v0 = vpack.c.bf16 %v863_v60, %v860_v63 }
 0x2fe   : > { %v2313_v40 = vpop.f32.mrf.mxu1  ;;  %v2297_v54 = vpop.f32.mrf.mxu0 }
 0x2ff   : > { %v2732_v36 = vpack.c.bf16 %v959_v29, %v956_v38  ;;  %1053 = vrot.lane.b32.xlu1 %v1044_v39, %s2470_s17  ;;  %v980_v50 = vadd.f32 %v2313_v40, %v2138_v19  ;;  %v986_v61 = vpack.c.bf16 %v855_v57, %v852_v59  ;;  %v876_v5 = vadd.f32 %v2297_v54, %v2129_v56 }
 0x300   : > { %v971_v41 = vpop.f32.mrf.mxu1  ;;  %v867_v55 = vpop.f32.mrf.mxu0  ;;  %v1077_v7 = vshrl.u32 %v1044_v39, 16 }
 0x301   : > { %1051 = vrot.lane.b32.xlu0 %v2732_v36, %s2470_s17  ;;  %v972_v45 = vadd.f32 %v2138_v19, %v971_v41  ;;  %v868_v2 = vadd.f32 %v2129_v56, %v867_v55  ;;  %v1063_v31 = vshrl.u32 %v2732_v36, 16 }
 0x302   : > { %v2314_v43 = vpop.f32.mrf.mxu1  ;;  %v2298_v58 = vpop.f32.mrf.mxu0 }
 0x303   : > { %v983_v48 = vadd.f32 %v2314_v43, %v2138_v19  ;;  %v879_v3 = vadd.f32 %v2298_v58, %v2129_v56 }
 0x304   : > { %v974_v44 = vpop.f32.mrf.mxu1  ;;  %v870_v62 = vpop.f32.mrf.mxu0 }
 0x305   : > { %v975_v46 = vadd.f32 %v2138_v19, %v974_v44  ;;  %v2738_v52 = vpack.c.bf16 %v983_v48, %v980_v50  ;;  %v871_v1 = vadd.f32 %v2129_v56, %v870_v62  ;;  %v989_v8 = vpack.c.bf16 %v879_v3, %v876_v5 }
 0x307   : > { %v2735_v49 = vpack.c.bf16 %v975_v46, %v972_v45  ;;  %v988_v4 = vpack.c.bf16 %v871_v1, %v868_v2  ;;  %v1093_v28 = vshrl.u32 %v2738_v52, 16 }
 0x309   : > { %1055 = vrot.lane.b32.xlu1 %v2735_v49, %s2470_s17  ;;  %v1085_v19 = vshrl.u32 %v2735_v49, 16 }
 0x30d   : > { %1057 = vrot.lane.b32.xlu1 %v2738_v52, %s2470_s17  ;;  %s2962_s17 = scalar_lea.sflag [#allocation3], %s297_s13 }
 0x31f   : > { %990 = vxpose.xlu0.c.b16.start [1/4] (short) (narrow) %v986_v61, 64 }
 0x323   : > { %991 = vxpose.xlu0.c.b16.cont [2/4] (short) (narrow) %v987_v0, 64 }
 0x327   : > { %992 = vxpose.xlu0.c.b16.cont [3/4] (short) (narrow) %v988_v4, 64 }
 0x32b   : > { %993 = vxpose.xlu0.c.b16.end [4/4] (short) (narrow) %v989_v8, 64 }
 0x371   : > { %v1054_v23 = vpop.permute.xlu1 %1053 }
 0x372   : > { %v1075_v25 = vpack.i.b16 %v1054_v23, %v1044_v39  ;;  %v1078_v13 = vshrl.u32 %v1054_v23, 16 }
 0x373   : > { %v1052_v26 = vpop.permute.xlu0 %1051 }
 0x374   : > { %v1079_v27 = vpack.i.b16 %v1078_v13, %v1077_v7  ;;  %v1195_v6 = vcombine.high %v1075_v25, %v2746_v21  ;;  %v1202_v12 = vrot.slane %v1075_v25, %v2748_v22  ;;  %v1061_v30 = vpack.i.b16 %v1052_v26, %v2732_v36 }
 0x375   : > { %v1064_v32 = vshrl.u32 %v1052_v26, 16 }
 0x376   : > { %v1209_v33 = vrot.slane %v1195_v6, %v2748_v22  ;;  %v1210_v34 = vcombine.high %v1202_v12, %v2473_v20  ;;  %v1217_v35 = vrot.slane %v1202_v12, %v2750_v24  ;;  %v1244_v37 = vcombine.high %v1079_v27, %v2746_v21 }
 0x377   : > { %v1251_v38 = vrot.slane %v1079_v27, %v2748_v22  ;;  %v1065_v39 = vpack.i.b16 %v1064_v32, %v1063_v31  ;;  %v1097_v29 = vcombine.high %v1061_v30, %v2746_v21  ;;  %v1104_v40 = vrot.slane %v1061_v30, %v2748_v22 }
 0x378   : > { %v1224_v36 = vrot.slane %v1210_v34, %v2750_v24  ;;  %v1225_v41 = vcombine.high %v1209_v33, %v2473_v20  ;;  %v1232_v42 = vrot.slane %v1209_v33, %v2750_v24  ;;  %v1258_v43 = vrot.slane %v1244_v37, %v2748_v22 }
 0x379   : > { %v1259_v44 = vcombine.high %v1251_v38, %v2473_v20  ;;  %v1266_v45 = vrot.slane %v1251_v38, %v2750_v24  ;;  %v1111_v46 = vrot.slane %v1097_v29, %v2748_v22  ;;  %v1112_v47 = vcombine.high %v1104_v40, %v2473_v20 }
 0x37a   : > { %v1239_v48 = vrot.slane %v1225_v41, %v2750_v24  ;;  %v1274_v50 = vcombine.high %v1258_v43, %v2473_v20  ;;  %v1281_v51 = vrot.slane %v1258_v43, %v2750_v24  ;;  %v1587_v53 = vcombine.low %v1217_v35, %v1224_v36 }
 0x37b   : > { %v1273_v54 = vrot.slane %v1259_v44, %v2750_v24  ;;  %v2159_v55 = vcombine.high %v1217_v35, %v1224_v36  ;;  %v1119_v56 = vrot.slane %v1104_v40, %v2750_v24  ;;  %v1126_v57 = vrot.slane %v1112_v47, %v2750_v24  ;;  %v1056_v36 = vpop.permute.xlu1 %1055 }
 0x37c   : > { %v1288_v58 = vrot.slane %v1274_v50, %v2750_v24  ;;  %v1594_v59 = vrot.slane %v1587_v53, %v2748_v22  ;;  %v1603_v60 = vcombine.low %v1232_v42, %v1239_v48  ;;  %v2160_v61 = vcombine.high %v1232_v42, %v1239_v48 }
 0x37d   : > { %v1602_v62 = vrot.slane %v2159_v55, %v2748_v22  ;;  %v1636_v63 = vcombine.low %v1266_v45, %v1273_v54  ;;  %v2161_v0 = vcombine.high %v1266_v45, %v1273_v54  ;;  %v1127_v1 = vcombine.high %v1111_v46, %v2473_v20 }
 0x37e   : > { %v1610_v2 = vrot.slane %v1603_v60, %v2748_v22  ;;  %v1618_v3 = vrot.slane %v2160_v61, %v2748_v22  ;;  %v1652_v4 = vcombine.low %v1281_v51, %v1288_v58  ;;  %v2162_v5 = vcombine.high %v1281_v51, %v1288_v58 }
 0x37f   : > { %v1619_v8 = vcombine.low %v1594_v59, %v1602_v62  ;;  %v1643_v9 = vrot.slane %v1636_v63, %v2748_v22  ;;  %v1651_v10 = vrot.slane %v2161_v0, %v2748_v22  ;;  %v1134_v11 = vrot.slane %v1111_v46, %v2750_v24 }
 0x380   : > { %v1627_v14 = vcombine.low %v1610_v2, %v1618_v3  ;;  %v1659_v15 = vrot.slane %v1652_v4, %v2748_v22  ;;  %v1667_v16 = vrot.slane %v2162_v5, %v2748_v22  ;;  %v1141_v17 = vrot.slane %v1127_v1, %v2750_v24  ;;  %v1058_v3 = vpop.permute.xlu1 %1057 }
 0x381   : > { %v1626_v18 = vrot.slane %v1619_v8, %v2750_v24  ;;  %v1668_v23 = vcombine.low %v1643_v9, %v1651_v10  ;;  %v1146_v25 = vcombine.high %v1065_v39, %v2746_v21  ;;  %v1153_v7 = vrot.slane %v1065_v39, %v2748_v22 }
 0x382   : > { %v1634_v13 = vrot.slane %v1627_v14, %v2750_v24  ;;  %v1676_v26 = vcombine.low %v1659_v15, %v1667_v16  ;;  %v1489_v27 = vcombine.low %v1119_v56, %v1126_v57  ;;  %v2155_v6 = vcombine.high %v1119_v56, %v1126_v57 }
 0x383   : > { %v1675_v12 = vrot.slane %v1668_v23, %v2750_v24  ;;  %v1160_v30 = vrot.slane %v1146_v25, %v2748_v22  ;;  %v1161_v31 = vcombine.high %v1153_v7, %v2473_v20  ;;  %v1168_v32 = vrot.slane %v1153_v7, %v2750_v24 }
 0x384   : > { %v1635_v33 = vcombine.low %v1626_v18, %v1634_v13  ;;  %v1683_v34 = vrot.slane %v1676_v26, %v2750_v24  ;;  %v1496_v35 = vrot.slane %v1489_v27, %v2748_v22  ;;  %v1504_v37 = vrot.slane %v2155_v6, %v2748_v22 }
 0x385   : > { %v1175_v38 = vrot.slane %v1161_v31, %v2750_v24  ;;  %v1176_v39 = vcombine.high %v1160_v30, %v2473_v20  ;;  %v1183_v29 = vrot.slane %v1160_v30, %v2750_v24  ;;  %v1505_v40 = vcombine.low %v1134_v11, %v1141_v17 }
 0x386   : > { %v1684_v41 = vcombine.low %v1675_v12, %v1683_v34  ;;  %v1890_v42 = vshrl.u32 %v1635_v33, 16  ;;  %v2156_v43 = vcombine.high %v1134_v11, %v1141_v17  ;;  %v1521_v44 = vcombine.low %v1496_v35, %v1504_v37 }
 0x387   : > { %v1190_v45 = vrot.slane %v1176_v39, %v2750_v24  ;;  %v1512_v46 = vrot.slane %v1505_v40, %v2748_v22  ;;  %v1538_v47 = vcombine.low %v1168_v32, %v1175_v38  ;;  %v2157_v48 = vcombine.high %v1168_v32, %v1175_v38 }
 0x388   : > { %v1889_v50 = vpack.i.b16 %v1684_v41, %v1635_v33  ;;  %v1891_v51 = vshrl.u32 %v1684_v41, 16  ;;  %v1520_v53 = vrot.slane %v2156_v43, %v2748_v22  ;;  %v1528_v54 = vrot.slane %v1521_v44, %v2750_v24 }
 0x389   : > { %v1545_v55 = vrot.slane %v1538_v47, %v2748_v22  ;;  %v1553_v56 = vrot.slane %v2157_v48, %v2748_v22  ;;  %v1554_v57 = vcombine.low %v1183_v29, %v1190_v45  ;;  %v2158_v58 = vcombine.high %v1183_v29, %v1190_v45 }
 0x38a   : > { %v1892_v59 = vpack.i.b16 %v1891_v51, %v1890_v42  ;;  %v2173_v60 = vcombine.low %v1889_v50, %v1889_v50  ;;  %v2174_v61 = vcombine.high %v1889_v50, %v1889_v50  ;;  %v1529_v62 = vcombine.low %v1512_v46, %v1520_v53  ;;  %v2857_v42 = vpop.trf.xlu0 }
 0x38b   : > { %v1561_v63 = vrot.slane %v1554_v57, %v2748_v22  ;;  %v1569_v0 = vrot.slane %v2158_v58, %v2748_v22  ;;  %v1570_v1 = vcombine.low %v1545_v55, %v1553_v56  ;;  %v1083_v2 = vpack.i.b16 %v1056_v36, %v2735_v49 }
 0x38c   : > { %v2181_v4 = vcombine.low %v1892_v59, %v1892_v59  ;;  %v2182_v5 = vcombine.high %v1892_v59, %v1892_v59  ;;  %1956 = vst.msk [vmem:[%s2814_s22 + $0x8] sm:$0xf] %vm1953_vm1, %v2173_v60  ;;  %1957 = vst.msk [vmem:[%s2814_s22 + $0xc] sm:$0xf] %vm1953_vm1, %v2174_v61  ;;  %v1536_v8 = vrot.slane %v1529_v62, %v2750_v24  ;;  %v1086_v9 = vshrl.u32 %v1056_v36, 16 }
 0x38d   : > { %v1577_v10 = vrot.slane %v1570_v1, %v2750_v24  ;;  %v1578_v11 = vcombine.low %v1561_v63, %v1569_v0  ;;  %v1293_v14 = vcombine.high %v1083_v2, %v2746_v21  ;;  %v1300_v15 = vrot.slane %v1083_v2, %v2748_v22 }
 0x38e   : > { %1964 = vst.msk [vmem:[%s2814_s22 + $0x28] sm:$0xf] %vm1953_vm1, %v2181_v4  ;;  %1965 = vst.msk [vmem:[%s2814_s22 + $0x2c] sm:$0xf] %vm1953_vm1, %v2182_v5  ;;  %v1537_v16 = vcombine.low %v1528_v54, %v1536_v8  ;;  %v1087_v17 = vpack.i.b16 %v1086_v9, %v1085_v19  ;;  %v1091_v18 = vpack.i.b16 %v1058_v3, %v2738_v52  ;;  %v1094_v23 = vshrl.u32 %v1058_v3, 16  ;;  %v2881_v5 = vpop.trf.xlu0 }
 0x38f   : > { %v1585_v25 = vrot.slane %v1578_v11, %v2750_v24  ;;  %v1307_v7 = vrot.slane %v1293_v14, %v2748_v22  ;;  %v1308_v13 = vcombine.high %v1300_v15, %v2473_v20  ;;  %v1315_v26 = vrot.slane %v1300_v15, %v2750_v24 }
 0x390   : > { %v1884_v27 = vshrl.u32 %v1537_v16, 16  ;;  %v1342_v6 = vcombine.high %v1087_v17, %v2746_v21  ;;  %v1349_v12 = vrot.slane %v1087_v17, %v2748_v22  ;;  %v2844_v49 = vpack.i.b16 %v1094_v23, %v1093_v28 }
 0x391   : > { %v1586_v19 = vcombine.low %v1577_v10, %v1585_v25  ;;  %v1322_v30 = vrot.slane %v1308_v13, %v2750_v24  ;;  %v1323_v31 = vcombine.high %v1307_v7, %v2473_v20  ;;  %v1330_v32 = vrot.slane %v1307_v7, %v2750_v24 }
 0x392   : > { %v1356_v33 = vrot.slane %v1342_v6, %v2748_v22  ;;  %v1357_v34 = vcombine.high %v1349_v12, %v2473_v20  ;;  %v1364_v35 = vrot.slane %v1349_v12, %v2750_v24  ;;  %v1391_v37 = vcombine.high %v1091_v18, %v2746_v21 }
 0x393   : > { %v1883_v38 = vpack.i.b16 %v1586_v19, %v1537_v16  ;;  %v1885_v39 = vshrl.u32 %v1586_v19, 16  ;;  %v1337_v52 = vrot.slane %v1323_v31, %v2750_v24  ;;  %v1685_v28 = vcombine.low %v1315_v26, %v1322_v30 }
 0x394   : > { %v1371_v29 = vrot.slane %v1357_v34, %v2750_v24  ;;  %v1372_v40 = vcombine.high %v1356_v33, %v2473_v20  ;;  %v1379_v36 = vrot.slane %v1356_v33, %v2750_v24  ;;  %v2163_v41 = vcombine.high %v1315_v26, %v1322_v30  ;;  %v1000_v34 = vpop.trf.xlu0 }
 0x395   : > { %v1886_v43 = vpack.i.b16 %v1885_v39, %v1884_v27  ;;  %v2171_v44 = vcombine.low %v1883_v38, %v1883_v38  ;;  %v2172_v45 = vcombine.high %v1883_v38, %v1883_v38  ;;  %v1692_v46 = vrot.slane %v1685_v28, %v2748_v22 }
 0x396   : > { %v1386_v47 = vrot.slane %v1372_v40, %v2750_v24  ;;  %v1700_v48 = vrot.slane %v2163_v41, %v2748_v22  ;;  %v1701_v50 = vcombine.low %v1330_v32, %v1337_v52  ;;  %v2164_v51 = vcombine.high %v1330_v32, %v1337_v52 }
 0x397   : > { %v2179_v53 = vcombine.low %v1886_v43, %v1886_v43  ;;  %v2180_v54 = vcombine.high %v1886_v43, %v1886_v43  ;;  %1954 = vst.msk [vmem:[%s2814_s22] sm:$0xf] %vm1953_vm1, %v2171_v44  ;;  %1955 = vst.msk [vmem:[%s2814_s22 + $0x4] sm:$0xf] %vm1953_vm1, %v2172_v45  ;;  %v1734_v55 = vcombine.low %v1364_v35, %v1371_v29 }
 0x398   : > { %v2165_v56 = vcombine.high %v1364_v35, %v1371_v29  ;;  %v1708_v57 = vrot.slane %v1701_v50, %v2748_v22  ;;  %v1716_v58 = vrot.slane %v2164_v51, %v2748_v22  ;;  %v1717_v59 = vcombine.low %v1692_v46, %v1700_v48 }
 0x399   : > { %v1750_v60 = vcombine.low %v1379_v36, %v1386_v47  ;;  %1962 = vst.msk [vmem:[%s2814_s22 + $0x20] sm:$0xf] %vm1953_vm1, %v2179_v53  ;;  %1963 = vst.msk [vmem:[%s2814_s22 + $0x24] sm:$0xf] %vm1953_vm1, %v2180_v54  ;;  %v1741_v61 = vrot.slane %v1734_v55, %v2748_v22  ;;  %v2166_v63 = vcombine.high %v1379_v36, %v1386_v47 }
 0x39a   : > { %v1749_v62 = vrot.slane %v2165_v56, %v2748_v22  ;;  %v1398_v0 = vrot.slane %v1091_v18, %v2748_v22  ;;  %v1724_v1 = vrot.slane %v1717_v59, %v2750_v24  ;;  %v1725_v2 = vcombine.low %v1708_v57, %v1716_v58  ;;  %v1001_v56 = vpop.trf.xlu0 }
 0x39b   : > { %v1757_v3 = vrot.slane %v1750_v60, %v2748_v22  ;;  %v1405_v4 = vrot.slane %v1391_v37, %v2748_v22  ;;  %v1765_v8 = vrot.slane %v2166_v63, %v2748_v22  ;;  %v1440_v17 = vcombine.high %v2844_v49, %v2746_v21 }
 0x39c   : > { %v1766_v9 = vcombine.low %v1741_v61, %v1749_v62  ;;  %v1406_v10 = vcombine.high %v1398_v0, %v2473_v20  ;;  %v1413_v11 = vrot.slane %v1398_v0, %v2750_v24  ;;  %v1732_v14 = vrot.slane %v1725_v2, %v2750_v24 }
 0x39d   : > { %v1421_v15 = vcombine.high %v1405_v4, %v2473_v20  ;;  %v1428_v16 = vrot.slane %v1405_v4, %v2750_v24  ;;  %v1774_v23 = vcombine.low %v1757_v3, %v1765_v8  ;;  %v1447_v7 = vrot.slane %v2844_v49, %v2748_v22 }
 0x39e   : > { %v1773_v18 = vrot.slane %v1766_v9, %v2750_v24  ;;  %v1420_v25 = vrot.slane %v1406_v10, %v2750_v24  ;;  %v1733_v13 = vcombine.low %v1724_v1, %v1732_v14  ;;  %v1454_v27 = vrot.slane %v1440_v17, %v2748_v22 }
 0x39f   : > { %v1435_v26 = vrot.slane %v1421_v15, %v2750_v24  ;;  %v2147_v6 = vcombine.low %v2857_v42, %v2857_v42  ;;  %v1781_v12 = vrot.slane %v1774_v23, %v2750_v24  ;;  %v1455_v21 = vcombine.high %v1447_v7, %v2473_v20 }
 0x3a0   : > { %v1462_v19 = vrot.slane %v1447_v7, %v2750_v24  ;;  %v1783_v30 = vcombine.low %v1413_v11, %v1420_v25  ;;  %v1896_v31 = vshrl.u32 %v1733_v13, 16  ;;  %v1470_v32 = vcombine.high %v1454_v27, %v2473_v20 }
 0x3a1   : > { %v1477_v49 = vrot.slane %v1454_v27, %v2750_v24  ;;  %v2167_v33 = vcombine.high %v1413_v11, %v1420_v25  ;;  %1035 = vst.msk [vmem:[%s2904_s23] sm:$0xf] %vm1034_vm2, %v2147_v6  ;;  %v1782_v35 = vcombine.low %v1773_v18, %v1781_v12  ;;  %v1469_v37 = vrot.slane %v1455_v21, %v2750_v24 }
 0x3a2   : > { %v1790_v38 = vrot.slane %v1783_v30, %v2748_v22  ;;  %v1799_v39 = vcombine.low %v1428_v16, %v1435_v26  ;;  %v1484_v52 = vrot.slane %v1470_v32, %v2750_v24  ;;  %v2168_v28 = vcombine.high %v1428_v16, %v1435_v26 }
 0x3a3   : > { %v1798_v20 = vrot.slane %v2167_v33, %v2748_v22  ;;  %v2148_v29 = vcombine.high %v2857_v42, %v2857_v42  ;;  %v1895_v40 = vpack.i.b16 %v1782_v35, %v1733_v13  ;;  %v1897_v36 = vshrl.u32 %v1782_v35, 16 }
 0x3a4   : > { %v1806_v41 = vrot.slane %v1799_v39, %v2748_v22  ;;  %v1832_v43 = vcombine.low %v1462_v19, %v1469_v37  ;;  %v1814_v44 = vrot.slane %v2168_v28, %v2748_v22  ;;  %v2169_v45 = vcombine.high %v1462_v19, %v1469_v37 }
 0x3a5   : > { %v1848_v46 = vcombine.low %v1477_v49, %v1484_v52  ;;  %1036 = vst.msk [vmem:[%s2904_s23 + $0x4] sm:$0xf] %vm1034_vm2, %v2148_v29  ;;  %v1898_v47 = vpack.i.b16 %v1897_v36, %v1896_v31  ;;  %v2175_v48 = vcombine.low %v1895_v40, %v1895_v40  ;;  %v2176_v50 = vcombine.high %v1895_v40, %v1895_v40 }
 0x3a6   : > { %v2919_v51 = vrot.slane %v1832_v43, %v2748_v22  ;;  %v1815_v42 = vcombine.low %v1790_v38, %v1798_v20  ;;  %v1823_v53 = vcombine.low %v1806_v41, %v1814_v44  ;;  %v1847_v54 = vrot.slane %v2169_v45, %v2748_v22 }
 0x3a7   : > { %v1855_v55 = vrot.slane %v1848_v46, %v2748_v22  ;;  %v2183_v57 = vcombine.low %v1898_v47, %v1898_v47  ;;  %v2184_v58 = vcombine.high %v1898_v47, %v1898_v47  ;;  %1958 = vst.msk [vmem:[%s2814_s22 + $0x10] sm:$0xf] %vm1953_vm1, %v2175_v48  ;;  %1959 = vst.msk [vmem:[%s2814_s22 + $0x14] sm:$0xf] %vm1953_vm1, %v2176_v50 }
 0x3a8   : > { %v2170_v59 = vcombine.high %v1477_v49, %v1484_v52  ;;  %v2149_v60 = vcombine.low %v2881_v5, %v2881_v5  ;;  %v1830_v61 = vrot.slane %v1823_v53, %v2750_v24  ;;  %v1864_v62 = vcombine.low %v2919_v51, %v1847_v54 }
 0x3a9   : > { %v2150_v63 = vcombine.high %v2881_v5, %v2881_v5  ;;  %v2151_v0 = vcombine.low %v1000_v34, %v1000_v34  ;;  %1966 = vst.msk [vmem:[%s2814_s22 + $0x30] sm:$0xf] %vm1953_vm1, %v2183_v57  ;;  %1967 = vst.msk [vmem:[%s2814_s22 + $0x34] sm:$0xf] %vm1953_vm1, %v2184_v58  ;;  %v2152_v2 = vcombine.high %v1000_v34, %v1000_v34 }
 0x3aa   : > { %v1863_v1 = vrot.slane %v2170_v59, %v2748_v22  ;;  %1037 = vst.msk [vmem:[%s2904_s23 + $0x8] sm:$0xf] %vm1034_vm2, %v2149_v60  ;;  %v2153_v3 = vcombine.low %v1001_v56, %v1001_v56  ;;  %v2154_v4 = vcombine.high %v1001_v56, %v1001_v56  ;;  %v1822_v5 = vrot.slane %v1815_v42, %v2750_v24 }
 0x3ab   : > { %1038 = vst.msk [vmem:[%s2904_s23 + $0xc] sm:$0xf] %vm1034_vm2, %v2150_v63  ;;  %1039 = vst.msk [vmem:[%s2904_s23 + $0x10] sm:$0xf] %vm1034_vm2, %v2151_v0 }
 0x3ac   : > { %v1872_v8 = vcombine.low %v1855_v55, %v1863_v1  ;;  %1040 = vst.msk [vmem:[%s2904_s23 + $0x14] sm:$0xf] %vm1034_vm2, %v2152_v2  ;;  %1041 = vst.msk [vmem:[%s2904_s23 + $0x18] sm:$0xf] %vm1034_vm2, %v2153_v3 }
 0x3ad   : > { %1042 = vst.msk [vmem:[%s2904_s23 + $0x1c] sm:$0xf] %vm1034_vm2, %v2154_v4 }
 0x3ae   : > { %2421 = shalt.err (!%p2418_p3)
}
 0x3af   : > { %s2422_s13 = scalar_lea.hbm %s2938_s10, 512  ;;  %s2426_s24 = scalar_lea.hbm %s3019_s7, 1024 }
 0x3b0   : > { %p2423_p4 = scmp.ne.s32.totalorder %s2938_s10, %s2422_s13  ;;  %p2427_p9 = scmp.lt.s32.totalorder %s2938_s10, %s3019_s7 }
 0x3b1   : > { %p2428_p10 = scmp.lt.s32.totalorder %s2426_s24, %s2422_s13 }
 0x3b2   : > { %p2424_p7 = pnand %p2423_p4, %p2560_p5 }
 0x3b3   : > { %p2429_p11 = por %p2428_p10, %p2427_p9 }
 0x3b4   : > { %p2425_p8 = pneg %p2424_p7 }
 0x3b6   : > { %p2430_p12 = pnand %p2429_p11, %p2425_p8 }
 0x3b8   : > { %2433 = shalt.err (!%p2430_p12)
}
 0x3b9   : > { %s2475_s18 = smov 64   ;;  %s2476_s19 = smov 4   ;;  %v1831_v22 = vcombine.low %v1822_v5, %v1830_v61  ;;  %v1871_v9 = vrot.slane %v1864_v62, %v2750_v24  ;;  %v1879_v10 = vrot.slane %v1872_v8, %v2750_v24 }
 0x3ba   : > { %2315 = dma.vmem_to_hbm [thread:$0]  (%p2560_p5), %s2940_s25, 512, %s2938_s10, %s2962_s17, %s2475_s18, %s2475_s18, %s2476_s19  }
 0x3bb   : > { %v1880_v11 = vcombine.low %v1871_v9, %v1879_v10  ;;  %v1902_v15 = vshrl.u32 %v1831_v22, 16 }
 0x3bd   : > { %v1901_v14 = vpack.i.b16 %v1880_v11, %v1831_v22  ;;  %v1903_v16 = vshrl.u32 %v1880_v11, 16 }
 0x3bf   : > { %v1904_v17 = vpack.i.b16 %v1903_v16, %v1902_v15  ;;  %v2177_v18 = vcombine.low %v1901_v14, %v1901_v14  ;;  %v2178_v23 = vcombine.high %v1901_v14, %v1901_v14 }
 0x3c1   : > { %v2185_v25 = vcombine.low %v1904_v17, %v1904_v17  ;;  %v2186_v7 = vcombine.high %v1904_v17, %v1904_v17  ;;  %1960 = vst.msk [vmem:[%s2814_s22 + $0x18] sm:$0xf] %vm1953_vm1, %v2177_v18  ;;  %1961 = vst.msk [vmem:[%s2814_s22 + $0x1c] sm:$0xf] %vm1953_vm1, %v2178_v23 }
 0x3c3   : > { %1968 = vst.msk [vmem:[%s2814_s22 + $0x38] sm:$0xf] %vm1953_vm1, %v2185_v25  ;;  %1969 = vst.msk [vmem:[%s2814_s22 + $0x3c] sm:$0xf] %vm1953_vm1, %v2186_v7 }
 0x3c4 PF: > { %p2321_p5 = scmp.ge.s32.totalorder %s2468_s30, 2  ;;  %s2007_s15 = sand.u32 1, %s2456_s27  }
 0x3c5   : > { %s2008_s25 = scalar_lea.sflag [#allocation3], %s2007_s15 }
 0x3c6   : > { %p2318_p13 = pnand %p2321_p5, %p2564_p6 }
 0x3c8   : > { %p2319_p0 = pneg %p2318_p13 }
 0x3ca   : > { %2451 = dma.done.wait (%p2319_p0), %s2008_s25, 512  }
 0x3cb   : > { %2453 = vsyncadd (%p2319_p0), %s2008_s25, 4294966784  ;;  %p19_p1 = scmp.ge.s32.totalorder %s2547_s11, 4   ;;  %s3023_s27 = smov %s2460_s28 }
 0x3cc   : > { %s3024_s28 = smov %s2464_s29  ;;  %s3025_s29 = smov %s2558_s14 }
 0x3cd   : > { %s3026_s30 = smov %s2547_s11  ;;  %21 = sbr.rel (!%p19_p1) target bundleno = 3 (0x3), region = 96 }
 0x3d2   :  { %2021 = vsyncpa [#allocation3], 1 }
 0x3d3   :  { %2023 = vsyncpa [#allocation3 + $0x1], 1 }

// kernel: tpu_custom_call.1
= control target key start
LH: loop header
LB: loop body
LE: loop exit
PB: predicated region body
PF: predicated region fallthrough
CT: control target
= control target key end

     0   :  { %14 = vsyncpa [#allocation3], 0  ;;  %s3012_s0 = inlined_call_operand.vmem [shape: bf16[2,8,2,8,128], index: 0, kind: input, shape index: {}]   ;;  %s3013_s1 = inlined_call_operand.vmem [shape: bf16[2,128,64], index: 1, kind: input, shape index: {}]   ;;  %s3014_s2 = inlined_call_operand.vmem [shape: f32[1,64], index: 2, kind: input, shape index: {}]   ;;  %s3015_s3 = inlined_call_operand.vmem [shape: bf16[64,64], index: 3, kind: input, shape index: {}]   ;;  %s3016_s4 = inlined_call_operand.vmem [shape: bf16[64,64], index: 4, kind: input, shape index: {}]   ;;  %s3017_s5 = inlined_call_operand.vmem [shape: f32[1,64], index: 5, kind: input, shape index: {}]   ;;  %s3018_s6 = inlined_call_operand.vmem [shape: f32[1,64], index: 6, kind: input, shape index: {}]   ;;  %s3019_s7 = inlined_call_operand.hbm [shape: bf16[2,2,32,64], index: 7, kind: output, shape index: {0}]   ;;  %s3020_s8 = inlined_call_operand.vmem [shape: bf16[2,2,64,32], index: 8, kind: output, shape index: {1}]  }
   0x1   :  { %16 = vsyncpa [#allocation3 + $0x1], 0  ;;  %s2522_s27 = smov 0   ;;  %s2524_s28 = smov 0  }
   0x2   :  { %s2526_s29 = smov 0   ;;  %s2528_s30 = smov 0  }
   0x3 LB: > { %s2543_s9 = sadd.s32 4294967295, %s2468_s30   ;;  %s2079_s10 = sadd.s32 4294967294, %s2468_s30   ;;  %s2468_s30 = sphi %s2528_s30, %s3026_s30   ;;  %s2464_s29 = sphi %s2526_s29, %s3025_s29   ;;  %s2460_s28 = sphi %s2524_s28, %s3024_s28   ;;  %s2456_s27 = sphi %s2522_s27, %s3023_s27  }
   0x4   : > { %s2547_s11 = sadd.s32 1, %s2468_s30   ;;  %s181_s12 = sadd.s32 1, %s2464_s29 }
   0x5   : > { %s178_s13 = ssub.s32 %s2468_s30, %s2547_s11  ;;  %p191_p0 = scmp.ne.s32.totalorder %s2464_s29, %s2460_s28 }
   0x6   : > { %p179_p1 = scmp.eq.s32.totalorder %s178_s13, 0  ;;  %p192_p2 = scmp.eq.s32.totalorder %s2543_s9, 1 }
   0x7   : > { %p197_p3 = scmp.ne.s32.totalorder %s2460_s28, %s2456_s27  ;;  %p198_p4 = scmp.eq.s32.totalorder %s2079_s10, 1 }
   0x8   : > { %s2558_s14 = scalar_select %p179_p1, %s2464_s29, %s181_s12  }
   0x9   : > { %p2560_p5 = por %p192_p2, %p191_p0  ;;  %p2564_p6 = por %p198_p4, %p197_p3 }
   0xa   : > { %p2082_p7 = scmp.ge.s32.totalorder %s2468_s30, 1  ;;  %p268_p8 = scmp.lt.s32.totalorder %s2468_s30, 3 }
   0xc   : > { %p269_p9 = pnand %p2082_p7, %p268_p8 }
   0xd   : > { %p307_p10 = scmp.lt.s32.totalorder (!%p269_p9), %s2543_s9, 1  ;;  %s2470_s17 = smov (!%p269_p9), 96  }
   0xe   : > { %272 = sbr.rel (%p269_p9) target bundleno = 964 (0x3c4), region = 48  ;;  %s2194_s24 = sshll.u32 (!%p269_p9), %s2543_s9, 9 }
   0xf   : > { %s2938_s10 = scalar_lea.hbm (!%p269_p9), %s3019_s7, %s2194_s24  ;;  %s2474_s19 = smov (!%p269_p9), [#allocation2]  }
  0x10   : > { %s2412_s20 = sshll.u32 (!%p269_p9), %s2474_s19, 4  ;;  %s2413_s20 = int_to_ptr.vmem [resolvable:$false] %s2412_s20 }
  0x13   : > { %v2360_v0 = vld [vmem:[%s3013_s1 + $0x78] sm:$0xff]   ;;  %v2362_v2 = vld [vmem:[%s3013_s1 + $0x70] sm:$0xff]   ;;  %v2364_v4 = vld [vmem:[%s3013_s1 + $0x68] sm:$0xff]   ;;  %s2590_s13 = scalar_select %p307_p10, %s2543_s9, 1  ;;  %vm656_vm0 = vcmask 523264   ;;  %vm1953_vm1 = vcmask 257024  }
  0x14   : > { %v2361_v1 = vld [vmem:[%s3013_s1 + $0x38] sm:$0xff]   ;;  %2235 = vmatprep.subr.bf16.mxu0 %v2360_v0  ;;  %v2363_v3 = vld [vmem:[%s3013_s1 + $0x30] sm:$0xff]   ;;  %v2365_v5 = vld [vmem:[%s3013_s1 + $0x28] sm:$0xff]   ;;  %vm1034_vm2 = vcmask 519168  }
  0x15   : > { %2259 = vmatprep.subr.bf16.mxu1 %v2361_v1  ;;  %2236 = vmatpush3.bf16.msra.mxu0 %v2360_v0  ;;  %v2366_v6 = vld [vmem:[%s3013_s1 + $0x60] sm:$0xff]   ;;  %s2192_s21 = sshll.u32 %s2590_s13, 6  ;;  %v2368_v8 = vld [vmem:[%s3013_s1 + $0x58] sm:$0xff]   ;;  %v2370_v10 = vld [vmem:[%s3013_s1 + $0x50] sm:$0xff]   ;;  %s297_s13 = sand.u32 1, %s2460_s28  }
  0x16   : > { %2260 = vmatpush3.bf16.msra.mxu1 %v2361_v1  ;;  %2237 = vmatprep.subr.bf16.mxu0 %v2362_v2  ;;  %v2367_v7 = vld [vmem:[%s3013_s1 + $0x20] sm:$0xff]   ;;  %v2369_v9 = vld [vmem:[%s3013_s1 + $0x18] sm:$0xff]   ;;  %s2610_s12 = scalar_lea.vmem %s3012_s0, %s2192_s21  ;;  %v2371_v11 = vld [vmem:[%s3013_s1 + $0x10] sm:$0xff]   ;;  %s2814_s22 = scalar_lea.vmem %s3020_s8, %s2192_s21 }
  0x17   : > { %2261 = vmatprep.subr.bf16.mxu1 %v2363_v3  ;;  %v2376_v12 = vld [vmem:[%s2610_s12 + $0x4] ss:$8 sps:$4 sm:$0xff]   ;;  %v2377_v13 = vld [vmem:[%s2610_s12] ss:$8 sps:$4 sm:$0xff]   ;;  %v2378_v18 = vld [vmem:[%s2610_s12 + $0x14] ss:$8 sps:$4 sm:$0xff]  }
  0x18   : > { %2251 = vmatprep.mubr.bf16.mxu0 %v2376_v12  ;;  %2275 = vmatprep.mubr.bf16.mxu1 %v2377_v13  ;;  %v2372_v14 = vld [vmem:[%s3013_s1 + $0x48] sm:$0xff]   ;;  %v2374_v16 = vld [vmem:[%s3013_s1 + $0x40] sm:$0xff]   ;;  %v2379_v19 = vld [vmem:[%s2610_s12 + $0x10] ss:$8 sps:$4 sm:$0xff]   ;;  %s2083_s21 = sshll.u32 %s297_s13, 5 }
  0x19   : > { %2238 = vmatpush3.bf16.msra.mxu0 %v2362_v2  ;;  %v2373_v15 = vld [vmem:[%s3013_s1 + $0x8] sm:$0xff]   ;;  %v2375_v17 = vld [vmem:[%s3013_s1] sm:$0xff]   ;;  %v2382_v22 = vld [vmem:[%s2610_s12 + $0x34] ss:$8 sps:$4 sm:$0xff]   ;;  %s2904_s23 = scalar_lea.vmem [#allocation2], %s2083_s21 }
  0x1a   : > { %2262 = vmatpush3.bf16.msra.mxu1 %v2363_v3  ;;  %2239 = vmatprep.subr.bf16.mxu0 %v2364_v4  ;;  %v2380_v20 = vld [vmem:[%s2610_s12 + $0x24] ss:$8 sps:$4 sm:$0xff]   ;;  %v2381_v21 = vld [vmem:[%s2610_s12 + $0x20] ss:$8 sps:$4 sm:$0xff]   ;;  %v2383_v23 = vld [vmem:[%s2610_s12 + $0x30] ss:$8 sps:$4 sm:$0xff]  }
  0x1b   : > { %2263 = vmatprep.subr.bf16.mxu1 %v2365_v5  ;;  %v2128_v26 = vld [vmem:[%s3014_s2] ss:$0 sm:$0xff]  ;;  %s1989_s25 = sshll.u32 %s2904_s23, 4  ;;  %s2414_s12 = scalar_lea.vmem %s2413_s20, 1024  ;;  %s2940_s25 = int_to_ptr.vmem [resolvable:$true] %s1989_s25 }
  0x1c   : > { %s2408_s18 = scalar_lea.vmem %s2940_s25, 512  ;;  %p2415_p0 = scmp.lt.s32.totalorder %s2940_s25, %s2413_s20 }
  0x1d   : > { %2240 = vmatpush3.bf16.msra.mxu0 %v2364_v4  ;;  %p2409_p11 = scmp.ne.s32.totalorder %s2940_s25, %s2408_s18  ;;  %p2416_p1 = scmp.lt.s32.totalorder %s2414_s12, %s2408_s18 }
  0x1e   : > { %2264 = vmatpush3.bf16.msra.mxu1 %v2365_v5  ;;  %2241 = vmatprep.subr.bf16.mxu0 %v2366_v6 }
  0x1f   : > { %2265 = vmatprep.subr.bf16.mxu1 %v2367_v7  ;;  %p2410_p12 = pnand %p2409_p11, %p2560_p5  ;;  %p2417_p2 = por %p2416_p1, %p2415_p0 }
  0x21   : > { %2242 = vmatpush3.bf16.msra.mxu0 %v2366_v6  ;;  %p2411_p13 = pneg %p2410_p12 }
  0x22   : > { %2266 = vmatpush3.bf16.msra.mxu1 %v2367_v7  ;;  %2243 = vmatprep.subr.bf16.mxu0 %v2368_v8 }
  0x23   : > { %2267 = vmatprep.subr.bf16.mxu1 %v2369_v9  ;;  %p2418_p3 = pnand %p2417_p2, %p2411_p13 }
  0x25   : > { %2244 = vmatpush3.bf16.msra.mxu0 %v2368_v8 }
  0x26   : > { %2268 = vmatpush3.bf16.msra.mxu1 %v2369_v9  ;;  %2245 = vmatprep.subr.bf16.mxu0 %v2370_v10 }
  0x27   : > { %2269 = vmatprep.subr.bf16.mxu1 %v2371_v11 }
  0x29   : > { %2246 = vmatpush3.bf16.msra.mxu0 %v2370_v10 }
  0x2a   : > { %2270 = vmatpush3.bf16.msra.mxu1 %v2371_v11  ;;  %2247 = vmatprep.subr.bf16.mxu0 %v2372_v14 }
  0x2b   : > { %2271 = vmatprep.subr.bf16.mxu1 %v2373_v15 }
  0x2d   : > { %2248 = vmatpush3.bf16.msra.mxu0 %v2372_v14 }
  0x2e   : > { %2272 = vmatpush3.bf16.msra.mxu1 %v2373_v15  ;;  %2249 = vmatprep.subr.bf16.mxu0 %v2374_v16 }
  0x2f   : > { %2273 = vmatprep.subr.bf16.mxu1 %v2375_v17 }
  0x31   : > { %2250 = vmatpush3.bf16.msra.mxu0 %v2374_v16 }
  0x32   : > { %2274 = vmatpush3.bf16.msra.mxu1 %v2375_v17 }
  0x34   : > { %2252 = vmatmul.mubr.bf16.vlgmr.msra.gmra.mxu0 %v2378_v18 }
  0x35   : > { %2276 = vmatmul.mubr.bf16.vlgmr.msra.gmra.mxu1 %v2379_v19  ;;  %2255 = vmatprep.mubr.bf16.mxu0 %v2380_v20 }
  0x36   : > { %2279 = vmatprep.mubr.bf16.mxu1 %v2381_v21 }
  0x3c   : > { %2256 = vmatmul.mubr.bf16.gmra.mxu0 %v2382_v22 }
  0x3d   : > { %2280 = vmatmul.mubr.bf16.gmra.mxu1 %v2383_v23 }
  0xf4   : > { %v2253_v24 = vpop.f32.mrf.mxu0 }
  0xf5   : > { %v2277_v25 = vpop.f32.mrf.mxu1 }
  0xf6   : > { %v619_v27 = vadd.f32 %v2277_v25, %v2253_v24  ;;  %v473_v28 = vpop.f32.mrf.mxu0 }
  0xf7   : > { %v610_v29 = vpop.f32.mrf.mxu1 }
  0xf8   : > { %v611_v30 = vadd.f32 %v610_v29, %v473_v28  ;;  %v2254_v31 = vpop.f32.mrf.mxu0  ;;  %v650_v32 = vadd.f32 %v2128_v26, %v619_v27 }
  0xf9   : > { %v2278_v33 = vpop.f32.mrf.mxu1 }
  0xfa   : > { %v622_v34 = vadd.f32 %v2278_v33, %v2254_v31  ;;  %v476_v35 = vpop.f32.mrf.mxu0  ;;  %v663_v36 = vsel %vm656_vm0, %v650_v32, 0.0  ;;  %v648_v37 = vadd.f32 %v2128_v26, %v611_v30 }
  0xfb   : > { %664 = vadd.xlane.f32.xlu1 %v663_v36  ;;  %v613_v38 = vpop.f32.mrf.mxu1 }
  0xfc   : > { %v614_v39 = vadd.f32 %v613_v38, %v476_v35  ;;  %v2257_v40 = vpop.f32.mrf.mxu0  ;;  %v657_v41 = vsel %vm656_vm0, %v648_v37, 0.0  ;;  %v651_v42 = vadd.f32 %v2128_v26, %v622_v34 }
  0xfd   : > { %v2281_v43 = vpop.f32.mrf.mxu1  ;;  %658 = vadd.xlane.f32.xlu0 %v657_v41  ;;  %v2384_v41 = vld [vmem:[%s3016_s4 + $0x18] sm:$0xff]  }
  0xfe   : > { %v489_v44 = vpop.f32.mrf.mxu0  ;;  %v666_v45 = vsel %vm656_vm0, %v651_v42, 0.0  ;;  %v649_v46 = vadd.f32 %v2128_v26, %v614_v39  ;;  %v635_v48 = vadd.f32 %v2281_v43, %v2257_v40  ;;  %2299 = vmatprep.subr.bf16.mxu1 %v2384_v41  ;;  %v2386_v43 = vld [vmem:[%s3016_s4 + $0x10] sm:$0xff]  }
  0xff   : > { %667 = vadd.xlane.f32.xlu1 %v666_v45  ;;  %v626_v47 = vpop.f32.mrf.mxu1  ;;  %2300 = vmatpush3.bf16.msra.mxu1 %v2384_v41  ;;  %v2388_v45 = vld [vmem:[%s3016_s4 + $0x8] sm:$0xff]  }
 0x100   : > { %v627_v49 = vadd.f32 %v626_v47, %v489_v44  ;;  %v2258_v50 = vpop.f32.mrf.mxu0  ;;  %v660_v51 = vsel %vm656_vm0, %v649_v46, 0.0  ;;  %v654_v59 = vadd.f32 %v2128_v26, %v635_v48  ;;  %v2387_v44 = vld [vmem:[%s3015_s3 + $0x10] sm:$0xff]   ;;  %2301 = vmatprep.subr.bf16.mxu1 %v2386_v43  ;;  %v2390_v47 = vld [vmem:[%s3016_s4] sm:$0xff]  }
 0x101   : > { %v2282_v52 = vpop.f32.mrf.mxu1  ;;  %661 = vadd.xlane.f32.xlu0 %v660_v51  ;;  %v2391_v48 = vld [vmem:[%s3015_s3] sm:$0xff]  }
 0x102   : > { %v492_v53 = vpop.f32.mrf.mxu0  ;;  %v652_v54 = vadd.f32 %v2128_v26, %v627_v49  ;;  %v638_v56 = vadd.f32 %v2282_v52, %v2258_v50  ;;  %v675_v62 = vsel %vm656_vm0, %v654_v59, 0.0 }
 0x103   : > { %v629_v55 = vpop.f32.mrf.mxu1  ;;  %2302 = vmatpush3.bf16.msra.mxu1 %v2386_v43 }
 0x104   : > { %v630_v57 = vadd.f32 %v629_v55, %v492_v53  ;;  %v669_v58 = vsel %vm656_vm0, %v652_v54, 0.0  ;;  %v655_v63 = vadd.f32 %v2128_v26, %v638_v56  ;;  %2303 = vmatprep.subr.bf16.mxu1 %v2388_v45 }
 0x105   : > { %670 = vadd.xlane.f32.xlu0 %v669_v58 }
 0x106   : > { %v653_v60 = vadd.f32 %v2128_v26, %v630_v57  ;;  %v678_v0 = vsel %vm656_vm0, %v655_v63, 0.0 }
 0x107   : > { %2304 = vmatpush3.bf16.msra.mxu1 %v2388_v45 }
 0x108   : > { %v672_v61 = vsel %vm656_vm0, %v653_v60, 0.0  ;;  %2305 = vmatprep.subr.bf16.mxu1 %v2390_v47 }
 0x109   : > { %673 = vadd.xlane.f32.xlu1 %v672_v61  ;;  %676 = vadd.xlane.f32.xlu0 %v675_v62 }
 0x10b   : > { %2306 = vmatpush3.bf16.msra.mxu1 %v2390_v47 }
 0x10d   : > { %679 = vadd.xlane.f32.xlu1 %v678_v0 }
 0x184   : > { %v665_v1 = vpop.xlane.xlu1 %664 }
 0x185   : > { %v684_v2 = vmul.f32 0.015625, %v665_v1 }
 0x186   : > { %v659_v3 = vpop.xlane.xlu0 %658 }
 0x187   : > { %v682_v4 = vmul.f32 0.015625, %v659_v3  ;;  %v2649_v6 = vsub.f32 %v650_v32, %v684_v2 }
 0x188   : > { %v668_v5 = vpop.xlane.xlu1 %667 }
 0x189   : > { %v2651_v7 = vsub.f32 %v648_v37, %v682_v4  ;;  %v685_v8 = vmul.f32 0.015625, %v668_v5  ;;  %v700_v15 = vmul.f32 %v2649_v6, %v2649_v6 }
 0x18a   : > { %v662_v9 = vpop.xlane.xlu0 %661 }
 0x18b   : > { %v683_v10 = vmul.f32 0.015625, %v662_v9  ;;  %v698_v11 = vmul.f32 %v2651_v7, %v2651_v7  ;;  %v2655_v12 = vsub.f32 %v651_v42, %v685_v8  ;;  %v712_v20 = vsel %vm656_vm0, %v700_v15, 0.0  ;;  %v2385_v42 = vld [vmem:[%s3015_s3 + $0x18] sm:$0xff]  }
 0x18c   : > { %2283 = vmatprep.subr.bf16.mxu0 %v2385_v42 }
 0x18d   : > { %v2657_v13 = vsub.f32 %v649_v46, %v683_v10  ;;  %v706_v14 = vsel %vm656_vm0, %v698_v11, 0.0  ;;  %v701_v22 = vmul.f32 %v2655_v12, %v2655_v12  ;;  %2284 = vmatpush3.bf16.msra.mxu0 %v2385_v42  ;;  %v2389_v46 = vld [vmem:[%s3015_s3 + $0x8] sm:$0xff]  }
 0x18e   : > { %707 = vadd.xlane.f32.xlu0 %v706_v14  ;;  %v671_v16 = vpop.xlane.xlu0 %670  ;;  %2285 = vmatprep.subr.bf16.mxu0 %v2387_v44 }
 0x18f   : > { %v686_v17 = vmul.f32 0.015625, %v671_v16  ;;  %v699_v18 = vmul.f32 %v2657_v13, %v2657_v13  ;;  %v715_v30 = vsel %vm656_vm0, %v701_v22, 0.0 }
 0x191   : > { %v2664_v19 = vsub.f32 %v652_v54, %v686_v17  ;;  %v709_v21 = vsel %vm656_vm0, %v699_v18, 0.0  ;;  %2286 = vmatpush3.bf16.msra.mxu0 %v2387_v44 }
 0x192   : > { %v674_v23 = vpop.xlane.xlu1 %673  ;;  %713 = vadd.xlane.f32.xlu0 %v712_v20  ;;  %710 = vadd.xlane.f32.xlu1 %v709_v21  ;;  %v677_v24 = vpop.xlane.xlu0 %676 }
 0x193   : > { %v687_v25 = vmul.f32 0.015625, %v674_v23  ;;  %v688_v26 = vmul.f32 0.015625, %v677_v24  ;;  %v702_v27 = vmul.f32 %v2664_v19, %v2664_v19  ;;  %2287 = vmatprep.subr.bf16.mxu0 %v2389_v46 }
 0x195   : > { %v2672_v28 = vsub.f32 %v653_v60, %v687_v25  ;;  %v2674_v29 = vsub.f32 %v654_v59, %v688_v26  ;;  %v718_v31 = vsel %vm656_vm0, %v702_v27, 0.0  ;;  %2288 = vmatpush3.bf16.msra.mxu0 %v2389_v46 }
 0x196   : > { %v680_v32 = vpop.xlane.xlu1 %679  ;;  %716 = vadd.xlane.f32.xlu1 %v715_v30  ;;  %719 = vadd.xlane.f32.xlu0 %v718_v31 }
 0x197   : > { %v689_v33 = vmul.f32 0.015625, %v680_v32  ;;  %v703_v34 = vmul.f32 %v2672_v28, %v2672_v28  ;;  %v704_v35 = vmul.f32 %v2674_v29, %v2674_v29  ;;  %2289 = vmatprep.subr.bf16.mxu0 %v2391_v48 }
 0x199   : > { %v2682_v36 = vsub.f32 %v655_v63, %v689_v33  ;;  %v721_v37 = vsel %vm656_vm0, %v703_v34, 0.0  ;;  %v724_v38 = vsel %vm656_vm0, %v704_v35, 0.0  ;;  %2290 = vmatpush3.bf16.msra.mxu0 %v2391_v48 }
 0x19a   : > { %722 = vadd.xlane.f32.xlu1 %v721_v37  ;;  %725 = vadd.xlane.f32.xlu0 %v724_v38 }
 0x19b   : > { %v705_v39 = vmul.f32 %v2682_v36, %v2682_v36 }
 0x19d   : > { %v727_v40 = vsel %vm656_vm0, %v705_v39, 0.0 }
 0x19e   : > { %728 = vadd.xlane.f32.xlu1 %v727_v40 }
 0x217   : > { %v708_v49 = vpop.xlane.xlu0 %707 }
 0x218   : > { %v730_v50 = vmul.f32 0.015625, %v708_v49 }
 0x21a   : > { %v738_v51 = vadd.f32 1e-05, %v730_v50 }
 0x21b   : > { %v711_v52 = vpop.xlane.xlu1 %710  ;;  %v714_v53 = vpop.xlane.xlu0 %713 }
 0x21c   : > { %v731_v54 = vmul.f32 0.015625, %v711_v52  ;;  %v732_v55 = vmul.f32 0.015625, %v714_v53  ;;  %2392 = vrsqrt.f32 %v738_v51 }
 0x21e   : > { %v739_v56 = vadd.f32 1e-05, %v731_v54  ;;  %v740_v57 = vadd.f32 1e-05, %v732_v55 }
 0x21f   : > { %v717_v58 = vpop.xlane.xlu1 %716  ;;  %v720_v59 = vpop.xlane.xlu0 %719 }
 0x220   : > { %2394 = vrsqrt.f32 %v739_v56  ;;  %v733_v60 = vmul.f32 0.015625, %v717_v58  ;;  %v734_v61 = vmul.f32 0.015625, %v720_v59  ;;  %v2129_v56 = vld [vmem:[%s3017_s5] ss:$0 sm:$0xff] }
 0x221   : > { %2396 = vrsqrt.f32 %v740_v57 }
 0x222   : > { %v741_v62 = vadd.f32 1e-05, %v733_v60  ;;  %v742_v63 = vadd.f32 1e-05, %v734_v61 }
 0x223   : > { %v723_v0 = vpop.xlane.xlu1 %722  ;;  %v726_v1 = vpop.xlane.xlu0 %725 }
 0x224   : > { %2398 = vrsqrt.f32 %v741_v62  ;;  %v735_v2 = vmul.f32 0.015625, %v723_v0  ;;  %v736_v3 = vmul.f32 0.015625, %v726_v1 }
 0x225   : > { %2400 = vrsqrt.f32 %v742_v63 }
 0x226   : > { %v743_v4 = vadd.f32 1e-05, %v735_v2  ;;  %v744_v5 = vadd.f32 1e-05, %v736_v3 }
 0x227   : > { %v729_v8 = vpop.xlane.xlu1 %728 }
 0x228   : > { %2402 = vrsqrt.f32 %v743_v4  ;;  %v737_v9 = vmul.f32 0.015625, %v729_v8 }
 0x229   : > { %2404 = vrsqrt.f32 %v744_v5  ;;  %v2393_v11 = vpop.eup %2392 }
 0x22a   : > { %v745_v10 = vadd.f32 1e-05, %v737_v9  ;;  %v754_v15 = vmul.f32 %v2393_v11, %v2651_v7  ;;  %v2471_v9 = vmov 1983009808   ;;  %v1101_v11 = vlaneseq }
 0x22c   : > { %2406 = vrsqrt.f32 %v745_v10  ;;  %v1099_v10 = vunpack.c.l.s4 %v2471_v9 }
 0x22d   : > { %v2395_v14 = vpop.eup %2394 }
 0x22e   : > { %v755_v16 = vmul.f32 %v2395_v14, %v2657_v13  ;;  %v2397_v17 = vpop.eup %2396  ;;  %v2472_v14 = vmov 1934713408  }
 0x22f   : > { %v756_v21 = vmul.f32 %v2397_v17, %v2649_v6  ;;  %v1102_v17 = vshrl.u32 %v1101_v11, 7 }
 0x230   : > { %v762_v18 = vpack.c.bf16 %v755_v16, %v754_v15  ;;  %v1114_v15 = vunpack.c.l.s4 %v2472_v14  ;;  %v1100_v16 = vunpack.c.0.s8 %v1099_v10 }
 0x231   : > { %v2399_v20 = vpop.eup %2398 }
 0x232   : > { %v757_v22 = vmul.f32 %v2399_v20, %v2655_v12  ;;  %2291 = vmatprep.mubr.msk.bf16.mxu0 %vm656_vm0, %v762_v18  ;;  %2307 = vmatprep.mubr.msk.bf16.mxu1 %vm656_vm0, %v762_v18  ;;  %v2401_v23 = vpop.eup %2400  ;;  %v1115_v18 = vunpack.c.0.s8 %v1114_v15  ;;  %v2473_v20 = vmov 0  }
 0x233   : > { %v758_v7 = vmul.f32 %v2401_v23, %v2664_v19  ;;  %v2138_v19 = vld [vmem:[%s3018_s6] ss:$0 sm:$0xff] }
 0x234   : > { %v763_v24 = vpack.c.bf16 %v757_v22, %v756_v21  ;;  %v2746_v21 = vpack.i.b16 %v2473_v20, %v2473_v20  ;;  %v2748_v22 = vsub.s32 %v1100_v16, %v1102_v17 }
 0x235   : > { %v2403_v25 = vpop.eup %2402 }
 0x236   : > { %2292 = vmatmul.mubr.msk.bf16.vlgmr.msra.gmra.mxu0 %vm656_vm0, %v763_v24  ;;  %2308 = vmatmul.mubr.msk.bf16.vlgmr.msra.gmra.mxu1 %vm656_vm0, %v763_v24  ;;  %v759_v13 = vmul.f32 %v2403_v25, %v2672_v28  ;;  %v2405_v26 = vpop.eup %2404  ;;  %v2750_v24 = vsub.s32 %v1115_v18, %v1102_v17 }
 0x237   : > { %v760_v12 = vmul.f32 %v2405_v26, %v2674_v29 }
 0x238   : > { %v764_v27 = vpack.c.bf16 %v759_v13, %v758_v7 }
 0x239   : > { %v2407_v6 = vpop.eup %2406 }
 0x23a   : > { %2295 = vmatprep.mubr.msk.bf16.mxu0 %vm656_vm0, %v764_v27  ;;  %2311 = vmatprep.mubr.msk.bf16.mxu1 %vm656_vm0, %v764_v27  ;;  %v761_v30 = vmul.f32 %v2407_v6, %v2682_v36 }
 0x23c   : > { %v765_v31 = vpack.c.bf16 %v761_v30, %v760_v12 }
 0x23e   : > { %2296 = vmatmul.mubr.msk.bf16.gmra.mxu0 %vm656_vm0, %v765_v31  ;;  %2312 = vmatmul.mubr.msk.bf16.gmra.mxu1 %vm656_vm0, %v765_v31 }
 0x2f6   : > { %v2309_v32 = vpop.f32.mrf.mxu1  ;;  %v2293_v42 = vpop.f32.mrf.mxu0 }
 0x2f7   : > { %v964_v34 = vadd.f32 %v2309_v32, %v2138_v19  ;;  %v860_v63 = vadd.f32 %v2293_v42, %v2129_v56 }
 0x2f8   : > { %v955_v28 = vpop.f32.mrf.mxu1  ;;  %v851_v47 = vpop.f32.mrf.mxu0 }
 0x2f9   : > { %v956_v38 = vadd.f32 %v2138_v19, %v955_v28  ;;  %v852_v59 = vadd.f32 %v2129_v56, %v851_v47 }
 0x2fa   : > { %v2310_v33 = vpop.f32.mrf.mxu1  ;;  %v2294_v51 = vpop.f32.mrf.mxu0 }
 0x2fb   : > { %v967_v35 = vadd.f32 %v2310_v33, %v2138_v19  ;;  %v863_v60 = vadd.f32 %v2294_v51, %v2129_v56 }
 0x2fc   : > { %v958_v37 = vpop.f32.mrf.mxu1  ;;  %v854_v53 = vpop.f32.mrf.mxu0 }
 0x2fd   : > { %v1044_v39 = vpack.c.bf16 %v967_v35, %v964_v34  ;;  %v959_v29 = vadd.f32 %v2138_v19, %v958_v37  ;;  %v855_v57 = vadd.f32 %v2129_v56, %v854_v53  ;;  %v987_v0 = vpack.c.bf16 %v863_v60, %v860_v63 }
 0x2fe   : > { %v2313_v40 = vpop.f32.mrf.mxu1  ;;  %v2297_v54 = vpop.f32.mrf.mxu0 }
 0x2ff   : > { %v2732_v36 = vpack.c.bf16 %v959_v29, %v956_v38  ;;  %1053 = vrot.lane.b32.xlu1 %v1044_v39, %s2470_s17  ;;  %v980_v50 = vadd.f32 %v2313_v40, %v2138_v19  ;;  %v986_v61 = vpack.c.bf16 %v855_v57, %v852_v59  ;;  %v876_v5 = vadd.f32 %v2297_v54, %v2129_v56 }
 0x300   : > { %v971_v41 = vpop.f32.mrf.mxu1  ;;  %v867_v55 = vpop.f32.mrf.mxu0  ;;  %v1077_v7 = vshrl.u32 %v1044_v39, 16 }
 0x301   : > { %1051 = vrot.lane.b32.xlu0 %v2732_v36, %s2470_s17  ;;  %v972_v45 = vadd.f32 %v2138_v19, %v971_v41  ;;  %v868_v2 = vadd.f32 %v2129_v56, %v867_v55  ;;  %v1063_v31 = vshrl.u32 %v2732_v36, 16 }
 0x302   : > { %v2314_v43 = vpop.f32.mrf.mxu1  ;;  %v2298_v58 = vpop.f32.mrf.mxu0 }
 0x303   : > { %v983_v48 = vadd.f32 %v2314_v43, %v2138_v19  ;;  %v879_v3 = vadd.f32 %v2298_v58, %v2129_v56 }
 0x304   : > { %v974_v44 = vpop.f32.mrf.mxu1  ;;  %v870_v62 = vpop.f32.mrf.mxu0 }
 0x305   : > { %v975_v46 = vadd.f32 %v2138_v19, %v974_v44  ;;  %v2738_v52 = vpack.c.bf16 %v983_v48, %v980_v50  ;;  %v871_v1 = vadd.f32 %v2129_v56, %v870_v62  ;;  %v989_v8 = vpack.c.bf16 %v879_v3, %v876_v5 }
 0x307   : > { %v2735_v49 = vpack.c.bf16 %v975_v46, %v972_v45  ;;  %v988_v4 = vpack.c.bf16 %v871_v1, %v868_v2  ;;  %v1093_v28 = vshrl.u32 %v2738_v52, 16 }
 0x309   : > { %1055 = vrot.lane.b32.xlu1 %v2735_v49, %s2470_s17  ;;  %v1085_v19 = vshrl.u32 %v2735_v49, 16 }
 0x30d   : > { %1057 = vrot.lane.b32.xlu1 %v2738_v52, %s2470_s17  ;;  %s2962_s17 = scalar_lea.sflag [#allocation3], %s297_s13 }
 0x31f   : > { %990 = vxpose.xlu0.c.b16.start [1/4] (short) (narrow) %v986_v61, 64 }
 0x323   : > { %991 = vxpose.xlu0.c.b16.cont [2/4] (short) (narrow) %v987_v0, 64 }
 0x327   : > { %992 = vxpose.xlu0.c.b16.cont [3/4] (short) (narrow) %v988_v4, 64 }
 0x32b   : > { %993 = vxpose.xlu0.c.b16.end [4/4] (short) (narrow) %v989_v8, 64 }
 0x371   : > { %v1054_v23 = vpop.permute.xlu1 %1053 }
 0x372   : > { %v1075_v25 = vpack.i.b16 %v1054_v23, %v1044_v39  ;;  %v1078_v13 = vshrl.u32 %v1054_v23, 16 }
 0x373   : > { %v1052_v26 = vpop.permute.xlu0 %1051 }
 0x374   : > { %v1079_v27 = vpack.i.b16 %v1078_v13, %v1077_v7  ;;  %v1195_v6 = vcombine.high %v1075_v25, %v2746_v21  ;;  %v1202_v12 = vrot.slane %v1075_v25, %v2748_v22  ;;  %v1061_v30 = vpack.i.b16 %v1052_v26, %v2732_v36 }
 0x375   : > { %v1064_v32 = vshrl.u32 %v1052_v26, 16 }
 0x376   : > { %v1209_v33 = vrot.slane %v1195_v6, %v2748_v22  ;;  %v1210_v34 = vcombine.high %v1202_v12, %v2473_v20  ;;  %v1217_v35 = vrot.slane %v1202_v12, %v2750_v24  ;;  %v1244_v37 = vcombine.high %v1079_v27, %v2746_v21 }
 0x377   : > { %v1251_v38 = vrot.slane %v1079_v27, %v2748_v22  ;;  %v1065_v39 = vpack.i.b16 %v1064_v32, %v1063_v31  ;;  %v1097_v29 = vcombine.high %v1061_v30, %v2746_v21  ;;  %v1104_v40 = vrot.slane %v1061_v30, %v2748_v22 }
 0x378   : > { %v1224_v36 = vrot.slane %v1210_v34, %v2750_v24  ;;  %v1225_v41 = vcombine.high %v1209_v33, %v2473_v20  ;;  %v1232_v42 = vrot.slane %v1209_v33, %v2750_v24  ;;  %v1258_v43 = vrot.slane %v1244_v37, %v2748_v22 }
 0x379   : > { %v1259_v44 = vcombine.high %v1251_v38, %v2473_v20  ;;  %v1266_v45 = vrot.slane %v1251_v38, %v2750_v24  ;;  %v1111_v46 = vrot.slane %v1097_v29, %v2748_v22  ;;  %v1112_v47 = vcombine.high %v1104_v40, %v2473_v20 }
 0x37a   : > { %v1239_v48 = vrot.slane %v1225_v41, %v2750_v24  ;;  %v1274_v50 = vcombine.high %v1258_v43, %v2473_v20  ;;  %v1281_v51 = vrot.slane %v1258_v43, %v2750_v24  ;;  %v1587_v53 = vcombine.low %v1217_v35, %v1224_v36 }
 0x37b   : > { %v1273_v54 = vrot.slane %v1259_v44, %v2750_v24  ;;  %v2159_v55 = vcombine.high %v1217_v35, %v1224_v36  ;;  %v1119_v56 = vrot.slane %v1104_v40, %v2750_v24  ;;  %v1126_v57 = vrot.slane %v1112_v47, %v2750_v24  ;;  %v1056_v36 = vpop.permute.xlu1 %1055 }
 0x37c   : > { %v1288_v58 = vrot.slane %v1274_v50, %v2750_v24  ;;  %v1594_v59 = vrot.slane %v1587_v53, %v2748_v22  ;;  %v1603_v60 = vcombine.low %v1232_v42, %v1239_v48  ;;  %v2160_v61 = vcombine.high %v1232_v42, %v1239_v48 }
 0x37d   : > { %v1602_v62 = vrot.slane %v2159_v55, %v2748_v22  ;;  %v1636_v63 = vcombine.low %v1266_v45, %v1273_v54  ;;  %v2161_v0 = vcombine.high %v1266_v45, %v1273_v54  ;;  %v1127_v1 = vcombine.high %v1111_v46, %v2473_v20 }
 0x37e   : > { %v1610_v2 = vrot.slane %v1603_v60, %v2748_v22  ;;  %v1618_v3 = vrot.slane %v2160_v61, %v2748_v22  ;;  %v1652_v4 = vcombine.low %v1281_v51, %v1288_v58  ;;  %v2162_v5 = vcombine.high %v1281_v51, %v1288_v58 }
 0x37f   : > { %v1619_v8 = vcombine.low %v1594_v59, %v1602_v62  ;;  %v1643_v9 = vrot.slane %v1636_v63, %v2748_v22  ;;  %v1651_v10 = vrot.slane %v2161_v0, %v2748_v22  ;;  %v1134_v11 = vrot.slane %v1111_v46, %v2750_v24 }
 0x380   : > { %v1627_v14 = vcombine.low %v1610_v2, %v1618_v3  ;;  %v1659_v15 = vrot.slane %v1652_v4, %v2748_v22  ;;  %v1667_v16 = vrot.slane %v2162_v5, %v2748_v22  ;;  %v1141_v17 = vrot.slane %v1127_v1, %v2750_v24  ;;  %v1058_v3 = vpop.permute.xlu1 %1057 }
 0x381   : > { %v1626_v18 = vrot.slane %v1619_v8, %v2750_v24  ;;  %v1668_v23 = vcombine.low %v1643_v9, %v1651_v10  ;;  %v1146_v25 = vcombine.high %v1065_v39, %v2746_v21  ;;  %v1153_v7 = vrot.slane %v1065_v39, %v2748_v22 }
 0x382   : > { %v1634_v13 = vrot.slane %v1627_v14, %v2750_v24  ;;  %v1676_v26 = vcombine.low %v1659_v15, %v1667_v16  ;;  %v1489_v27 = vcombine.low %v1119_v56, %v1126_v57  ;;  %v2155_v6 = vcombine.high %v1119_v56, %v1126_v57 }
 0x383   : > { %v1675_v12 = vrot.slane %v1668_v23, %v2750_v24  ;;  %v1160_v30 = vrot.slane %v1146_v25, %v2748_v22  ;;  %v1161_v31 = vcombine.high %v1153_v7, %v2473_v20  ;;  %v1168_v32 = vrot.slane %v1153_v7, %v2750_v24 }
 0x384   : > { %v1635_v33 = vcombine.low %v1626_v18, %v1634_v13  ;;  %v1683_v34 = vrot.slane %v1676_v26, %v2750_v24  ;;  %v1496_v35 = vrot.slane %v1489_v27, %v2748_v22  ;;  %v1504_v37 = vrot.slane %v2155_v6, %v2748_v22 }
 0x385   : > { %v1175_v38 = vrot.slane %v1161_v31, %v2750_v24  ;;  %v1176_v39 = vcombine.high %v1160_v30, %v2473_v20  ;;  %v1183_v29 = vrot.slane %v1160_v30, %v2750_v24  ;;  %v1505_v40 = vcombine.low %v1134_v11, %v1141_v17 }
 0x386   : > { %v1684_v41 = vcombine.low %v1675_v12, %v1683_v34  ;;  %v1890_v42 = vshrl.u32 %v1635_v33, 16  ;;  %v2156_v43 = vcombine.high %v1134_v11, %v1141_v17  ;;  %v1521_v44 = vcombine.low %v1496_v35, %v1504_v37 }
 0x387   : > { %v1190_v45 = vrot.slane %v1176_v39, %v2750_v24  ;;  %v1512_v46 = vrot.slane %v1505_v40, %v2748_v22  ;;  %v1538_v47 = vcombine.low %v1168_v32, %v1175_v38  ;;  %v2157_v48 = vcombine.high %v1168_v32, %v1175_v38 }
 0x388   : > { %v1889_v50 = vpack.i.b16 %v1684_v41, %v1635_v33  ;;  %v1891_v51 = vshrl.u32 %v1684_v41, 16  ;;  %v1520_v53 = vrot.slane %v2156_v43, %v2748_v22  ;;  %v1528_v54 = vrot.slane %v1521_v44, %v2750_v24 }
 0x389   : > { %v1545_v55 = vrot.slane %v1538_v47, %v2748_v22  ;;  %v1553_v56 = vrot.slane %v2157_v48, %v2748_v22  ;;  %v1554_v57 = vcombine.low %v1183_v29, %v1190_v45  ;;  %v2158_v58 = vcombine.high %v1183_v29, %v1190_v45 }
 0x38a   : > { %v1892_v59 = vpack.i.b16 %v1891_v51, %v1890_v42  ;;  %v2173_v60 = vcombine.low %v1889_v50, %v1889_v50  ;;  %v2174_v61 = vcombine.high %v1889_v50, %v1889_v50  ;;  %v1529_v62 = vcombine.low %v1512_v46, %v1520_v53  ;;  %v2857_v42 = vpop.trf.xlu0 }
 0x38b   : > { %v1561_v63 = vrot.slane %v1554_v57, %v2748_v22  ;;  %v1569_v0 = vrot.slane %v2158_v58, %v2748_v22  ;;  %v1570_v1 = vcombine.low %v1545_v55, %v1553_v56  ;;  %v1083_v2 = vpack.i.b16 %v1056_v36, %v2735_v49 }
 0x38c   : > { %v2181_v4 = vcombine.low %v1892_v59, %v1892_v59  ;;  %v2182_v5 = vcombine.high %v1892_v59, %v1892_v59  ;;  %1956 = vst.msk [vmem:[%s2814_s22 + $0x8] sm:$0xf] %vm1953_vm1, %v2173_v60  ;;  %1957 = vst.msk [vmem:[%s2814_s22 + $0xc] sm:$0xf] %vm1953_vm1, %v2174_v61  ;;  %v1536_v8 = vrot.slane %v1529_v62, %v2750_v24  ;;  %v1086_v9 = vshrl.u32 %v1056_v36, 16 }
 0x38d   : > { %v1577_v10 = vrot.slane %v1570_v1, %v2750_v24  ;;  %v1578_v11 = vcombine.low %v1561_v63, %v1569_v0  ;;  %v1293_v14 = vcombine.high %v1083_v2, %v2746_v21  ;;  %v1300_v15 = vrot.slane %v1083_v2, %v2748_v22 }
 0x38e   : > { %1964 = vst.msk [vmem:[%s2814_s22 + $0x28] sm:$0xf] %vm1953_vm1, %v2181_v4  ;;  %1965 = vst.msk [vmem:[%s2814_s22 + $0x2c] sm:$0xf] %vm1953_vm1, %v2182_v5  ;;  %v1537_v16 = vcombine.low %v1528_v54, %v1536_v8  ;;  %v1087_v17 = vpack.i.b16 %v1086_v9, %v1085_v19  ;;  %v1091_v18 = vpack.i.b16 %v1058_v3, %v2738_v52  ;;  %v1094_v23 = vshrl.u32 %v1058_v3, 16  ;;  %v2881_v5 = vpop.trf.xlu0 }
 0x38f   : > { %v1585_v25 = vrot.slane %v1578_v11, %v2750_v24  ;;  %v1307_v7 = vrot.slane %v1293_v14, %v2748_v22  ;;  %v1308_v13 = vcombine.high %v1300_v15, %v2473_v20  ;;  %v1315_v26 = vrot.slane %v1300_v15, %v2750_v24 }
 0x390   : > { %v1884_v27 = vshrl.u32 %v1537_v16, 16  ;;  %v1342_v6 = vcombine.high %v1087_v17, %v2746_v21  ;;  %v1349_v12 = vrot.slane %v1087_v17, %v2748_v22  ;;  %v2844_v49 = vpack.i.b16 %v1094_v23, %v1093_v28 }
 0x391   : > { %v1586_v19 = vcombine.low %v1577_v10, %v1585_v25  ;;  %v1322_v30 = vrot.slane %v1308_v13, %v2750_v24  ;;  %v1323_v31 = vcombine.high %v1307_v7, %v2473_v20  ;;  %v1330_v32 = vrot.slane %v1307_v7, %v2750_v24 }
 0x392   : > { %v1356_v33 = vrot.slane %v1342_v6, %v2748_v22  ;;  %v1357_v34 = vcombine.high %v1349_v12, %v2473_v20  ;;  %v1364_v35 = vrot.slane %v1349_v12, %v2750_v24  ;;  %v1391_v37 = vcombine.high %v1091_v18, %v2746_v21 }
 0x393   : > { %v1883_v38 = vpack.i.b16 %v1586_v19, %v1537_v16  ;;  %v1885_v39 = vshrl.u32 %v1586_v19, 16  ;;  %v1337_v52 = vrot.slane %v1323_v31, %v2750_v24  ;;  %v1685_v28 = vcombine.low %v1315_v26, %v1322_v30 }
 0x394   : > { %v1371_v29 = vrot.slane %v1357_v34, %v2750_v24  ;;  %v1372_v40 = vcombine.high %v1356_v33, %v2473_v20  ;;  %v1379_v36 = vrot.slane %v1356_v33, %v2750_v24  ;;  %v2163_v41 = vcombine.high %v1315_v26, %v1322_v30  ;;  %v1000_v34 = vpop.trf.xlu0 }
 0x395   : > { %v1886_v43 = vpack.i.b16 %v1885_v39, %v1884_v27  ;;  %v2171_v44 = vcombine.low %v1883_v38, %v1883_v38  ;;  %v2172_v45 = vcombine.high %v1883_v38, %v1883_v38  ;;  %v1692_v46 = vrot.slane %v1685_v28, %v2748_v22 }
 0x396   : > { %v1386_v47 = vrot.slane %v1372_v40, %v2750_v24  ;;  %v1700_v48 = vrot.slane %v2163_v41, %v2748_v22  ;;  %v1701_v50 = vcombine.low %v1330_v32, %v1337_v52  ;;  %v2164_v51 = vcombine.high %v1330_v32, %v1337_v52 }
 0x397   : > { %v2179_v53 = vcombine.low %v1886_v43, %v1886_v43  ;;  %v2180_v54 = vcombine.high %v1886_v43, %v1886_v43  ;;  %1954 = vst.msk [vmem:[%s2814_s22] sm:$0xf] %vm1953_vm1, %v2171_v44  ;;  %1955 = vst.msk [vmem:[%s2814_s22 + $0x4] sm:$0xf] %vm1953_vm1, %v2172_v45  ;;  %v1734_v55 = vcombine.low %v1364_v35, %v1371_v29 }
 0x398   : > { %v2165_v56 = vcombine.high %v1364_v35, %v1371_v29  ;;  %v1708_v57 = vrot.slane %v1701_v50, %v2748_v22  ;;  %v1716_v58 = vrot.slane %v2164_v51, %v2748_v22  ;;  %v1717_v59 = vcombine.low %v1692_v46, %v1700_v48 }
 0x399   : > { %v1750_v60 = vcombine.low %v1379_v36, %v1386_v47  ;;  %1962 = vst.msk [vmem:[%s2814_s22 + $0x20] sm:$0xf] %vm1953_vm1, %v2179_v53  ;;  %1963 = vst.msk [vmem:[%s2814_s22 + $0x24] sm:$0xf] %vm1953_vm1, %v2180_v54  ;;  %v1741_v61 = vrot.slane %v1734_v55, %v2748_v22  ;;  %v2166_v63 = vcombine.high %v1379_v36, %v1386_v47 }
 0x39a   : > { %v1749_v62 = vrot.slane %v2165_v56, %v2748_v22  ;;  %v1398_v0 = vrot.slane %v1091_v18, %v2748_v22  ;;  %v1724_v1 = vrot.slane %v1717_v59, %v2750_v24  ;;  %v1725_v2 = vcombine.low %v1708_v57, %v1716_v58  ;;  %v1001_v56 = vpop.trf.xlu0 }
 0x39b   : > { %v1757_v3 = vrot.slane %v1750_v60, %v2748_v22  ;;  %v1405_v4 = vrot.slane %v1391_v37, %v2748_v22  ;;  %v1765_v8 = vrot.slane %v2166_v63, %v2748_v22  ;;  %v1440_v17 = vcombine.high %v2844_v49, %v2746_v21 }
 0x39c   : > { %v1766_v9 = vcombine.low %v1741_v61, %v1749_v62  ;;  %v1406_v10 = vcombine.high %v1398_v0, %v2473_v20  ;;  %v1413_v11 = vrot.slane %v1398_v0, %v2750_v24  ;;  %v1732_v14 = vrot.slane %v1725_v2, %v2750_v24 }
 0x39d   : > { %v1421_v15 = vcombine.high %v1405_v4, %v2473_v20  ;;  %v1428_v16 = vrot.slane %v1405_v4, %v2750_v24  ;;  %v1774_v23 = vcombine.low %v1757_v3, %v1765_v8  ;;  %v1447_v7 = vrot.slane %v2844_v49, %v2748_v22 }
 0x39e   : > { %v1773_v18 = vrot.slane %v1766_v9, %v2750_v24  ;;  %v1420_v25 = vrot.slane %v1406_v10, %v2750_v24  ;;  %v1733_v13 = vcombine.low %v1724_v1, %v1732_v14  ;;  %v1454_v27 = vrot.slane %v1440_v17, %v2748_v22 }
 0x39f   : > { %v1435_v26 = vrot.slane %v1421_v15, %v2750_v24  ;;  %v2147_v6 = vcombine.low %v2857_v42, %v2857_v42  ;;  %v1781_v12 = vrot.slane %v1774_v23, %v2750_v24  ;;  %v1455_v21 = vcombine.high %v1447_v7, %v2473_v20 }
 0x3a0   : > { %v1462_v19 = vrot.slane %v1447_v7, %v2750_v24  ;;  %v1783_v30 = vcombine.low %v1413_v11, %v1420_v25  ;;  %v1896_v31 = vshrl.u32 %v1733_v13, 16  ;;  %v1470_v32 = vcombine.high %v1454_v27, %v2473_v20 }
 0x3a1   : > { %v1477_v49 = vrot.slane %v1454_v27, %v2750_v24  ;;  %v2167_v33 = vcombine.high %v1413_v11, %v1420_v25  ;;  %1035 = vst.msk [vmem:[%s2904_s23] sm:$0xf] %vm1034_vm2, %v2147_v6  ;;  %v1782_v35 = vcombine.low %v1773_v18, %v1781_v12  ;;  %v1469_v37 = vrot.slane %v1455_v21, %v2750_v24 }
 0x3a2   : > { %v1790_v38 = vrot.slane %v1783_v30, %v2748_v22  ;;  %v1799_v39 = vcombine.low %v1428_v16, %v1435_v26  ;;  %v1484_v52 = vrot.slane %v1470_v32, %v2750_v24  ;;  %v2168_v28 = vcombine.high %v1428_v16, %v1435_v26 }
 0x3a3   : > { %v1798_v20 = vrot.slane %v2167_v33, %v2748_v22  ;;  %v2148_v29 = vcombine.high %v2857_v42, %v2857_v42  ;;  %v1895_v40 = vpack.i.b16 %v1782_v35, %v1733_v13  ;;  %v1897_v36 = vshrl.u32 %v1782_v35, 16 }
 0x3a4   : > { %v1806_v41 = vrot.slane %v1799_v39, %v2748_v22  ;;  %v1832_v43 = vcombine.low %v1462_v19, %v1469_v37  ;;  %v1814_v44 = vrot.slane %v2168_v28, %v2748_v22  ;;  %v2169_v45 = vcombine.high %v1462_v19, %v1469_v37 }
 0x3a5   : > { %v1848_v46 = vcombine.low %v1477_v49, %v1484_v52  ;;  %1036 = vst.msk [vmem:[%s2904_s23 + $0x4] sm:$0xf] %vm1034_vm2, %v2148_v29  ;;  %v1898_v47 = vpack.i.b16 %v1897_v36, %v1896_v31  ;;  %v2175_v48 = vcombine.low %v1895_v40, %v1895_v40  ;;  %v2176_v50 = vcombine.high %v1895_v40, %v1895_v40 }
 0x3a6   : > { %v2919_v51 = vrot.slane %v1832_v43, %v2748_v22  ;;  %v1815_v42 = vcombine.low %v1790_v38, %v1798_v20  ;;  %v1823_v53 = vcombine.low %v1806_v41, %v1814_v44  ;;  %v1847_v54 = vrot.slane %v2169_v45, %v2748_v22 }
 0x3a7   : > { %v1855_v55 = vrot.slane %v1848_v46, %v2748_v22  ;;  %v2183_v57 = vcombine.low %v1898_v47, %v1898_v47  ;;  %v2184_v58 = vcombine.high %v1898_v47, %v1898_v47  ;;  %1958 = vst.msk [vmem:[%s2814_s22 + $0x10] sm:$0xf] %vm1953_vm1, %v2175_v48  ;;  %1959 = vst.msk [vmem:[%s2814_s22 + $0x14] sm:$0xf] %vm1953_vm1, %v2176_v50 }
 0x3a8   : > { %v2170_v59 = vcombine.high %v1477_v49, %v1484_v52  ;;  %v2149_v60 = vcombine.low %v2881_v5, %v2881_v5  ;;  %v1830_v61 = vrot.slane %v1823_v53, %v2750_v24  ;;  %v1864_v62 = vcombine.low %v2919_v51, %v1847_v54 }
 0x3a9   : > { %v2150_v63 = vcombine.high %v2881_v5, %v2881_v5  ;;  %v2151_v0 = vcombine.low %v1000_v34, %v1000_v34  ;;  %1966 = vst.msk [vmem:[%s2814_s22 + $0x30] sm:$0xf] %vm1953_vm1, %v2183_v57  ;;  %1967 = vst.msk [vmem:[%s2814_s22 + $0x34] sm:$0xf] %vm1953_vm1, %v2184_v58  ;;  %v2152_v2 = vcombine.high %v1000_v34, %v1000_v34 }
 0x3aa   : > { %v1863_v1 = vrot.slane %v2170_v59, %v2748_v22  ;;  %1037 = vst.msk [vmem:[%s2904_s23 + $0x8] sm:$0xf] %vm1034_vm2, %v2149_v60  ;;  %v2153_v3 = vcombine.low %v1001_v56, %v1001_v56  ;;  %v2154_v4 = vcombine.high %v1001_v56, %v1001_v56  ;;  %v1822_v5 = vrot.slane %v1815_v42, %v2750_v24 }
 0x3ab   : > { %1038 = vst.msk [vmem:[%s2904_s23 + $0xc] sm:$0xf] %vm1034_vm2, %v2150_v63  ;;  %1039 = vst.msk [vmem:[%s2904_s23 + $0x10] sm:$0xf] %vm1034_vm2, %v2151_v0 }
 0x3ac   : > { %v1872_v8 = vcombine.low %v1855_v55, %v1863_v1  ;;  %1040 = vst.msk [vmem:[%s2904_s23 + $0x14] sm:$0xf] %vm1034_vm2, %v2152_v2  ;;  %1041 = vst.msk [vmem:[%s2904_s23 + $0x18] sm:$0xf] %vm1034_vm2, %v2153_v3 }
 0x3ad   : > { %1042 = vst.msk [vmem:[%s2904_s23 + $0x1c] sm:$0xf] %vm1034_vm2, %v2154_v4 }
 0x3ae   : > { %2421 = shalt.err (!%p2418_p3)
}
 0x3af   : > { %s2422_s13 = scalar_lea.hbm %s2938_s10, 512  ;;  %s2426_s24 = scalar_lea.hbm %s3019_s7, 1024 }
 0x3b0   : > { %p2423_p4 = scmp.ne.s32.totalorder %s2938_s10, %s2422_s13  ;;  %p2427_p9 = scmp.lt.s32.totalorder %s2938_s10, %s3019_s7 }
 0x3b1   : > { %p2428_p10 = scmp.lt.s32.totalorder %s2426_s24, %s2422_s13 }
 0x3b2   : > { %p2424_p7 = pnand %p2423_p4, %p2560_p5 }
 0x3b3   : > { %p2429_p11 = por %p2428_p10, %p2427_p9 }
 0x3b4   : > { %p2425_p8 = pneg %p2424_p7 }
 0x3b6   : > { %p2430_p12 = pnand %p2429_p11, %p2425_p8 }
 0x3b8   : > { %2433 = shalt.err (!%p2430_p12)
}
 0x3b9   : > { %s2475_s18 = smov 64   ;;  %s2476_s19 = smov 4   ;;  %v1831_v22 = vcombine.low %v1822_v5, %v1830_v61  ;;  %v1871_v9 = vrot.slane %v1864_v62, %v2750_v24  ;;  %v1879_v10 = vrot.slane %v1872_v8, %v2750_v24 }
 0x3ba   : > { %2315 = dma.vmem_to_hbm [thread:$0]  (%p2560_p5), %s2940_s25, 512, %s2938_s10, %s2962_s17, %s2475_s18, %s2475_s18, %s2476_s19  }
 0x3bb   : > { %v1880_v11 = vcombine.low %v1871_v9, %v1879_v10  ;;  %v1902_v15 = vshrl.u32 %v1831_v22, 16 }
 0x3bd   : > { %v1901_v14 = vpack.i.b16 %v1880_v11, %v1831_v22  ;;  %v1903_v16 = vshrl.u32 %v1880_v11, 16 }
 0x3bf   : > { %v1904_v17 = vpack.i.b16 %v1903_v16, %v1902_v15  ;;  %v2177_v18 = vcombine.low %v1901_v14, %v1901_v14  ;;  %v2178_v23 = vcombine.high %v1901_v14, %v1901_v14 }
 0x3c1   : > { %v2185_v25 = vcombine.low %v1904_v17, %v1904_v17  ;;  %v2186_v7 = vcombine.high %v1904_v17, %v1904_v17  ;;  %1960 = vst.msk [vmem:[%s2814_s22 + $0x18] sm:$0xf] %vm1953_vm1, %v2177_v18  ;;  %1961 = vst.msk [vmem:[%s2814_s22 + $0x1c] sm:$0xf] %vm1953_vm1, %v2178_v23 }
 0x3c3   : > { %1968 = vst.msk [vmem:[%s2814_s22 + $0x38] sm:$0xf] %vm1953_vm1, %v2185_v25  ;;  %1969 = vst.msk [vmem:[%s2814_s22 + $0x3c] sm:$0xf] %vm1953_vm1, %v2186_v7 }
 0x3c4 PF: > { %p2321_p5 = scmp.ge.s32.totalorder %s2468_s30, 2  ;;  %s2007_s15 = sand.u32 1, %s2456_s27  }
 0x3c5   : > { %s2008_s25 = scalar_lea.sflag [#allocation3], %s2007_s15 }
 0x3c6   : > { %p2318_p13 = pnand %p2321_p5, %p2564_p6 }
 0x3c8   : > { %p2319_p0 = pneg %p2318_p13 }
 0x3ca   : > { %2451 = dma.done.wait (%p2319_p0), %s2008_s25, 512  }
 0x3cb   : > { %2453 = vsyncadd (%p2319_p0), %s2008_s25, 4294966784  ;;  %p19_p1 = scmp.ge.s32.totalorder %s2547_s11, 4   ;;  %s3023_s27 = smov %s2460_s28 }
 0x3cc   : > { %s3024_s28 = smov %s2464_s29  ;;  %s3025_s29 = smov %s2558_s14 }
 0x3cd   : > { %s3026_s30 = smov %s2547_s11  ;;  %21 = sbr.rel (!%p19_p1) target bundleno = 3 (0x3), region = 96 }
 0x3d2   :  { %2021 = vsyncpa [#allocation3], 1 }
 0x3d3   :  { %2023 = vsyncpa [#allocation3 + $0x1], 1 }

</bundles_post_ra>
